<compile_context>
chip_gen: v7x
topology: tpu7x:2x2x1
jax: 0.10.0
libtpu: 0.0.40
codegen_flags: <defaults>
</compile_context>

<pallas_src>
import jax
import jax.numpy as jnp
from jax.experimental import pallas as pl
from jax.experimental.pallas import tpu as pltpu

FEATURE = 512  # fixed by nn.Linear(512, 512) in the module


def _attn_kernel(xq_ref, xk_ref, a_ref, u_ref, wv_ref, bv_ref,
                 weights_out_ref, proto_out_ref):
    xq = xq_ref[...]                                       # [1, 512] f32
    xk = xk_ref[...]                                       # [N, 512] f32

    # Folded query vector: q_fold = (xq @ Wq^T + bq) @ Wk = xq @ A + u,  A bf16, u f32.
    q_fold = jnp.dot(xq.astype(jnp.bfloat16), a_ref[...],
                     preferred_element_type=jnp.float32) + u_ref[...]      # [1, 512] f32

    # Value projection: rv = xk @ Wv^T + bv  (Wv pre-transposed to [in, out], bf16).
    rv = jnp.dot(xk.astype(jnp.bfloat16), wv_ref[...],
                 preferred_element_type=jnp.float32) + bv_ref[...]         # [N, 512] f32

    # scores[i] = <rk[i], rq> up to a key-independent constant (bk . rq), which softmax(dim=0)
    # cancels.  VPU elementwise multiply + lane reduce, all f32.
    scores = jnp.sum(xk * q_fold, axis=-1, keepdims=True)                  # [N, 1] f32

    # softmax over dim=0 (across the N keys), f32 throughout.
    m = jnp.max(scores, axis=0, keepdims=True)
    e = jnp.exp(scores - m)
    w = e / jnp.sum(e, axis=0, keepdims=True)                              # [N, 1]

    # prototype = rv^T @ w, computed lane-dense as [1, 512] via a sublane reduce
    # (w broadcasts over the 512 lanes of rv); no rv transpose, unmasked row store.
    proto_out_ref[...] = jnp.sum(w * rv, axis=0, keepdims=True)            # [1, 512] f32
    weights_out_ref[...] = w


def prepare_params(params, weight_dtype=jnp.bfloat16):
    """One-time parameter prep: fold Wq into Wk (f32 product, single bf16 cast), pre-transpose
    Wv to [in, out], cast weights to bf16, keep biases/folded vectors in f32."""
    wq, bq = params["query_reduce"]   # wq: [out=512, in=512], bq: [512]
    wk, bk = params["key_reduce"]
    wv, bv = params["value_reduce"]
    del bk  # bk only enters through the key-independent bk·rq term, which softmax cancels.

    wq32 = wq.astype(jnp.float32)
    wk32 = wk.astype(jnp.float32)
    a = (wq32.T @ wk32).astype(weight_dtype)                   # [512, 512] = Wq^T @ Wk, bf16
    u = (bq.astype(jnp.float32) @ wk32)[None, :]               # [1, 512]  = bq @ Wk,     f32
    return {
        "a": a,                                                # [512, 512] bf16
        "u": u,                                                # [1, 512]   f32
        "wv_t": wv.T.astype(weight_dtype),                     # [512, 512] bf16 (= Wv^T)
        "bv": bv[None, :].astype(jnp.float32),                 # [1, 512]   f32
    }


def _cost_estimate(b, n):
    per_item_flops = (2 * FEATURE * FEATURE            # q_fold matvec
                      + 2 * n * FEATURE * FEATURE      # value projection
                      + 2 * n * FEATURE                # scores reduce
                      + 2 * n * FEATURE                # prototype reduce
                      + 6 * n)                         # softmax elementwise
    bytes_accessed = (2 * FEATURE * FEATURE * 2        # A + Wv^T bf16 (fetched once)
                      + 2 * FEATURE * 4                # u + bv f32
                      + b * ((n + 1) * FEATURE * 4     # activations f32
                             + (n + FEATURE) * 4))     # outputs f32
    return pl.CostEstimate(flops=b * per_item_flops,
                           transcendentals=b * n,
                           bytes_accessed=bytes_accessed)


def enhanced_self_attention_batched(x_to_query, x_to_key, prepared):
    """Batched forward.

    x_to_query: [B, 1, 512], x_to_key: [B, N, 512]
    Returns (weights [B, N, 1], output [B, 512, 1]).
    The weight tensors are DMA'd once per call and reused across the batch grid.
    """
    b, n = x_to_key.shape[0], x_to_key.shape[1]

    weights, proto_row = pl.pallas_call(
        _attn_kernel,
        grid=(b,),
        out_shape=(
            jax.ShapeDtypeStruct((b, n, 1), jnp.float32),
            jax.ShapeDtypeStruct((b, 1, FEATURE), jnp.float32),   # lane-dense prototype rows
        ),
        in_specs=[
            pl.BlockSpec((None, 1, FEATURE), lambda i: (i, 0, 0)),   # x_to_query
            pl.BlockSpec((None, n, FEATURE), lambda i: (i, 0, 0)),   # x_to_key
            pl.BlockSpec((FEATURE, FEATURE), lambda i: (0, 0)),      # A   (constant -> one DMA)
            pl.BlockSpec((1, FEATURE), lambda i: (0, 0)),            # u   (constant)
            pl.BlockSpec((FEATURE, FEATURE), lambda i: (0, 0)),      # Wv^T (constant)
            pl.BlockSpec((1, FEATURE), lambda i: (0, 0)),            # bv  (constant)
        ],
        out_specs=(
            pl.BlockSpec((None, n, 1), lambda i: (i, 0, 0)),
            pl.BlockSpec((None, 1, FEATURE), lambda i: (i, 0, 0)),
        ),
        compiler_params=pltpu.CompilerParams(
            dimension_semantics=("parallel",)),                      # v7x: split batch over TCs
        cost_estimate=_cost_estimate(b, n),
    )(x_to_query, x_to_key,
      prepared["a"], prepared["u"], prepared["wv_t"], prepared["bv"])

    # [B, 1, 512] -> [B, 512, 1] (pure reshape, same memory layout): PyTorch column vectors.
    return weights, proto_row.reshape(b, FEATURE, 1)


def enhanced_self_attention(x_to_query, x_to_key, prepared):
    """Unbatched module-style forward. x_to_query: [1, 512], x_to_key: [N, 512].
    Returns (weights [N, 1], output [512, 1])."""
    w, out = enhanced_self_attention_batched(x_to_query[None], x_to_key[None], prepared)
    return w[0], out[0]


def init_params(key, feature_size, intermediate_size):
    """Deterministic synthetic parameter init (shapes match the nn.Module)."""
    ks = jax.random.split(key, 12)

    def linear(kw, kb, out_dim, in_dim):
        scale = 1.0 / jnp.sqrt(in_dim)
        w = jax.random.uniform(kw, (out_dim, in_dim), jnp.float32, -scale, scale)
        b = jax.random.uniform(kb, (out_dim,), jnp.float32, -scale, scale)
        return w, b

    return {
        "key_reduce": linear(ks[0], ks[1], 512, 512),
        "query_reduce": linear(ks[2], ks[3], 512, 512),
        "value_reduce": linear(ks[4], ks[5], 512, 512),
        # Unused in forward(), kept for structural parity with __init__:
        "key_expand": linear(ks[6], ks[7], 1, intermediate_size),
        "query_expand": linear(ks[8], ks[9], 1, intermediate_size),
        "value": linear(ks[10], ks[11], feature_size, feature_size),
    }


def reference_module(x_to_query, x_to_key, params):
    """Pure-JAX f32 reference with the exact PyTorch forward semantics."""
    wq, bq = params["query_reduce"]
    wk, bk = params["key_reduce"]
    wv, bv = params["value_reduce"]
    hi = jax.lax.Precision.HIGHEST
    rk = jnp.dot(x_to_key, wk.T, precision=hi) + bk
    rq = jnp.dot(x_to_query, wq.T, precision=hi) + bq
    rv = jnp.dot(x_to_key, wv.T, precision=hi) + bv
    w = jax.nn.softmax(jnp.dot(rk, rq.T, precision=hi), axis=0).reshape(-1, 1)
    out = jnp.dot(rv.T, w, precision=hi)
    return w, out


def reference_fused(x_to_query, x_to_key, prepared):
    """Matched-precision reference replicating the kernel's fused bf16/f32 math exactly."""
    q_fold = jnp.dot(x_to_query.astype(jnp.bfloat16), prepared["a"],
                     preferred_element_type=jnp.float32) + prepared["u"]
    rv = jnp.dot(x_to_key.astype(jnp.bfloat16), prepared["wv_t"],
                 preferred_element_type=jnp.float32) + prepared["bv"]
    scores = jnp.sum(x_to_key * q_fold, axis=-1, keepdims=True)
    w = jax.nn.softmax(scores, axis=0)
    out = jnp.sum(w * rv, axis=0)[:, None]
    return w, out


if __name__ == "__main__":
    feature_size = 512
    intermediate_size = 32
    num_attention_weights = 8   # N
    batch = 4                   # B: number of forward() invocations amortized per pallas_call

    key = jax.random.PRNGKey(0)
    kp, kq, kk = jax.random.split(key, 3)

    params = init_params(kp, feature_size, intermediate_size)
    prepared = prepare_params(params)   # one-time: fold Wq into Wk, transpose Wv, bf16 cast

    xq_batch = jax.random.normal(kq, (batch, 1, FEATURE), jnp.float32)
    xk_batch = jax.random.normal(kk, (batch, num_attention_weights, FEATURE), jnp.float32)

    weights_b, output_b = enhanced_self_attention_batched(xq_batch, xk_batch, prepared)
    jax.block_until_ready((weights_b, output_b))

    assert weights_b.shape == (batch, num_attention_weights, 1)
    assert output_b.shape == (batch, FEATURE, 1)

    for i in range(batch):
        # Tight matched-precision check (same fused bf16 weights, f32 accumulation).
        w_ref_m, o_ref_m = reference_fused(xq_batch[i], xk_batch[i], prepared)
        assert jnp.allclose(weights_b[i], w_ref_m, atol=2e-3, rtol=2e-3)
        assert jnp.allclose(output_b[i], o_ref_m, atol=2e-3, rtol=2e-3)

        # Softmax sanity and loose check against the full-f32 semantics of the PyTorch module
        # (bf16 weight folding introduces small perturbations; tolerance deliberately generous).
        assert jnp.allclose(jnp.sum(weights_b[i]), 1.0, atol=1e-4)
        w_ref_f, o_ref_f = reference_module(xq_batch[i], xk_batch[i], params)
        assert jnp.allclose(weights_b[i], w_ref_f, atol=0.25, rtol=0.25)
        assert jnp.allclose(output_b[i], o_ref_f, atol=0.25, rtol=0.25)

    # Unbatched module-style API (single forward call), shape parity with the nn.Module.
    w1, o1 = enhanced_self_attention(xq_batch[0], xk_batch[0], prepared)
    jax.block_until_ready((w1, o1))
    assert w1.shape == (num_attention_weights, 1)
    assert o1.shape == (FEATURE, 1)
    assert jnp.allclose(w1, weights_b[0], atol=1e-6)
    assert jnp.allclose(o1, output_b[0], atol=1e-6)

    print("KERNEL_OK")
</pallas_src>

<mosaic_0001>
module attributes {stable_mosaic.version = 11 : i64} {
  func.func @_attn_kernel(%arg0: i32, %arg1: memref<1x1x512xf32, #tpu.memory_space<vmem>>, %arg2: memref<1x8x512xf32, #tpu.memory_space<vmem>>, %arg3: memref<512x512xbf16, #tpu.memory_space<vmem>>, %arg4: memref<1x512xf32, #tpu.memory_space<vmem>>, %arg5: memref<512x512xbf16, #tpu.memory_space<vmem>>, %arg6: memref<1x512xf32, #tpu.memory_space<vmem>>, %arg7: memref<1x8x1xf32, #tpu.memory_space<vmem>>, %arg8: memref<1x1x512xf32, #tpu.memory_space<vmem>>) attributes {dimension_semantics = [#tpu.dimension_semantics<parallel>], iteration_bounds = array<i64: 4>, scalar_prefetch = 0 : i64, scratch_operands = 0 : i64, tpu.core_type = #tpu.core_type<tc>, window_params = [{transform_indices = @transform_0, window_bounds = array<i64: 1, 1, 512>}, {transform_indices = @transform_1, window_bounds = array<i64: 1, 8, 512>}, {pipeline_mode = #tpu.pipeline_mode<synchronous>, transform_indices = @transform_2, window_bounds = array<i64: 512, 512>}, {pipeline_mode = #tpu.pipeline_mode<synchronous>, transform_indices = @transform_3, window_bounds = array<i64: 1, 512>}, {pipeline_mode = #tpu.pipeline_mode<synchronous>, transform_indices = @transform_4, window_bounds = array<i64: 512, 512>}, {pipeline_mode = #tpu.pipeline_mode<synchronous>, transform_indices = @transform_5, window_bounds = array<i64: 1, 512>}, {transform_indices = @transform_6, window_bounds = array<i64: 1, 8, 1>}, {transform_indices = @transform_7, window_bounds = array<i64: 1, 1, 512>}]} {
    %c0 = arith.constant 0 : index
    %c0_0 = arith.constant 0 : index
    %c0_1 = arith.constant 0 : index
    %0 = vector.load %arg1[%c0, %c0_0, %c0_1] : memref<1x1x512xf32, #tpu.memory_space<vmem>>, vector<1x1x512xf32>
    %1 = vector.shape_cast %0 : vector<1x1x512xf32> to vector<1x512xf32>
    %c0_2 = arith.constant 0 : index
    %c0_3 = arith.constant 0 : index
    %c0_4 = arith.constant 0 : index
    %2 = vector.load %arg2[%c0_2, %c0_3, %c0_4] : memref<1x8x512xf32, #tpu.memory_space<vmem>>, vector<1x8x512xf32>
    %3 = vector.shape_cast %2 : vector<1x8x512xf32> to vector<8x512xf32>
    %4 = arith.truncf %1 : vector<1x512xf32> to vector<1x512xbf16>
    %c0_5 = arith.constant 0 : index
    %c0_6 = arith.constant 0 : index
    %5 = vector.load %arg3[%c0_5, %c0_6] : memref<512x512xbf16, #tpu.memory_space<vmem>>, vector<512x512xbf16>
    %cst = arith.constant dense<0.000000e+00> : vector<1x512xf32>
    %6 = tpu.matmul %4, %5, %cst {dimension_numbers = #tpu.dot_dimension_numbers<[1], [0], [0], [1], [0, 0, 1, 1], [], []>} : vector<1x512xbf16>, vector<512x512xbf16>, vector<1x512xf32> -> vector<1x512xf32>
    %c0_7 = arith.constant 0 : index
    %c0_8 = arith.constant 0 : index
    %7 = vector.load %arg4[%c0_7, %c0_8] : memref<1x512xf32, #tpu.memory_space<vmem>>, vector<1x512xf32>
    %8 = arith.addf %6, %7 : vector<1x512xf32>
    %9 = arith.truncf %3 : vector<8x512xf32> to vector<8x512xbf16>
    %c0_9 = arith.constant 0 : index
    %c0_10 = arith.constant 0 : index
    %10 = vector.load %arg5[%c0_9, %c0_10] : memref<512x512xbf16, #tpu.memory_space<vmem>>, vector<512x512xbf16>
    %cst_11 = arith.constant dense<0.000000e+00> : vector<8x512xf32>
    %11 = tpu.matmul %9, %10, %cst_11 {dimension_numbers = #tpu.dot_dimension_numbers<[1], [0], [0], [1], [0, 0, 1, 1], [], []>} : vector<8x512xbf16>, vector<512x512xbf16>, vector<8x512xf32> -> vector<8x512xf32>
    %c0_12 = arith.constant 0 : index
    %c0_13 = arith.constant 0 : index
    %12 = vector.load %arg6[%c0_12, %c0_13] : memref<1x512xf32, #tpu.memory_space<vmem>>, vector<1x512xf32>
    %13 = vector.broadcast %12 : vector<1x512xf32> to vector<8x512xf32>
    %14 = arith.addf %11, %13 : vector<8x512xf32>
    %15 = vector.broadcast %8 : vector<1x512xf32> to vector<8x512xf32>
    %16 = arith.mulf %3, %15 : vector<8x512xf32>
    %cst_14 = arith.constant dense<0.000000e+00> : vector<8xf32>
    %17 = vector.multi_reduction <add>, %16, %cst_14 [1] : vector<8x512xf32> to vector<8xf32>
    %18 = vector.shape_cast %17 : vector<8xf32> to vector<8x1xf32>
    %cst_15 = arith.constant dense<0xFF800000> : vector<1xf32>
    %19 = vector.multi_reduction <maximumf>, %18, %cst_15 [0] : vector<8x1xf32> to vector<1xf32>
    %20 = vector.shape_cast %19 : vector<1xf32> to vector<1x1xf32>
    %21 = vector.broadcast %20 : vector<1x1xf32> to vector<8x1xf32>
    %22 = arith.subf %18, %21 : vector<8x1xf32>
    %23 = math.exp %22 : vector<8x1xf32>
    %cst_16 = arith.constant dense<0.000000e+00> : vector<1xf32>
    %24 = vector.multi_reduction <add>, %23, %cst_16 [0] : vector<8x1xf32> to vector<1xf32>
    %25 = vector.shape_cast %24 : vector<1xf32> to vector<1x1xf32>
    %26 = vector.broadcast %25 : vector<1x1xf32> to vector<8x1xf32>
    %27 = arith.divf %23, %26 : vector<8x1xf32>
    %28 = vector.broadcast %27 : vector<8x1xf32> to vector<8x512xf32>
    %29 = arith.mulf %28, %14 : vector<8x512xf32>
    %cst_17 = arith.constant dense<0.000000e+00> : vector<512xf32>
    %30 = vector.multi_reduction <add>, %29, %cst_17 [0] : vector<8x512xf32> to vector<512xf32>
    %31 = vector.shape_cast %30 : vector<512xf32> to vector<1x512xf32>
    %c0_18 = arith.constant 0 : index
    %c0_19 = arith.constant 0 : index
    %c0_20 = arith.constant 0 : index
    %32 = vector.load %arg8[%c0_18, %c0_19, %c0_20] : memref<1x1x512xf32, #tpu.memory_space<vmem>>, vector<1x1x512xf32>
    %33 = vector.shape_cast %32 : vector<1x1x512xf32> to vector<1x512xf32>
    %34 = vector.shape_cast %31 : vector<1x512xf32> to vector<1x1x512xf32>
    tpu.vector_store %arg8[%c0_18, %c0_19, %c0_20], %34 {strides = array<i32>} : memref<1x1x512xf32, #tpu.memory_space<vmem>>, vector<1x1x512xf32>,
    %c0_21 = arith.constant 0 : index
    %c0_22 = arith.constant 0 : index
    %c0_23 = arith.constant 0 : index
    %35 = vector.load %arg7[%c0_21, %c0_22, %c0_23] : memref<1x8x1xf32, #tpu.memory_space<vmem>>, vector<1x8x1xf32>
    %36 = vector.shape_cast %35 : vector<1x8x1xf32> to vector<8x1xf32>
    %37 = vector.shape_cast %27 : vector<8x1xf32> to vector<1x8x1xf32>
    tpu.vector_store %arg7[%c0_21, %c0_22, %c0_23], %37 {strides = array<i32>} : memref<1x8x1xf32, #tpu.memory_space<vmem>>, vector<1x8x1xf32>,
    return
  }
  func.func @transform_0(%arg0: i32) -> (i32, i32, i32) {
    %c0_i32 = arith.constant 0 : i32
    %c0_i32_0 = arith.constant 0 : i32
    %c0_i32_1 = arith.constant 0 : i32
    return %arg0, %c0_i32, %c0_i32_0 : i32, i32, i32
  }
  func.func @transform_1(%arg0: i32) -> (i32, i32, i32) {
    %c0_i32 = arith.constant 0 : i32
    %c0_i32_0 = arith.constant 0 : i32
    %c0_i32_1 = arith.constant 0 : i32
    return %arg0, %c0_i32, %c0_i32_0 : i32, i32, i32
  }
  func.func @transform_2(%arg0: i32) -> (i32, i32) {
    %c0_i32 = arith.constant 0 : i32
    %c0_i32_0 = arith.constant 0 : i32
    %c0_i32_1 = arith.constant 0 : i32
    return %c0_i32, %c0_i32_0 : i32, i32
  }
  func.func @transform_3(%arg0: i32) -> (i32, i32) {
    %c0_i32 = arith.constant 0 : i32
    %c0_i32_0 = arith.constant 0 : i32
    %c0_i32_1 = arith.constant 0 : i32
    return %c0_i32, %c0_i32_0 : i32, i32
  }
  func.func @transform_4(%arg0: i32) -> (i32, i32) {
    %c0_i32 = arith.constant 0 : i32
    %c0_i32_0 = arith.constant 0 : i32
    %c0_i32_1 = arith.constant 0 : i32
    return %c0_i32, %c0_i32_0 : i32, i32
  }
  func.func @transform_5(%arg0: i32) -> (i32, i32) {
    %c0_i32 = arith.constant 0 : i32
    %c0_i32_0 = arith.constant 0 : i32
    %c0_i32_1 = arith.constant 0 : i32
    return %c0_i32, %c0_i32_0 : i32, i32
  }
  func.func @transform_6(%arg0: i32) -> (i32, i32, i32) {
    %c0_i32 = arith.constant 0 : i32
    %c0_i32_0 = arith.constant 0 : i32
    %c0_i32_1 = arith.constant 0 : i32
    return %arg0, %c0_i32, %c0_i32_0 : i32, i32, i32
  }
  func.func @transform_7(%arg0: i32) -> (i32, i32, i32) {
    %c0_i32 = arith.constant 0 : i32
    %c0_i32_0 = arith.constant 0 : i32
    %c0_i32_1 = arith.constant 0 : i32
    return %arg0, %c0_i32, %c0_i32_0 : i32, i32, i32
  }
}

</mosaic_0001>

<bundles_post_ra>
// kernel: tpu_custom_call.1
= control target key start
LH: loop header
LB: loop body
LE: loop exit
PB: predicated region body
PF: predicated region fallthrough
CT: control target
= control target key end

     0   :  { %s3935_s0 = inlined_call_operand.hbm [shape: f32[4,1,512], index: 0, kind: input, shape index: {}]   ;;  %s3936_s1 = inlined_call_operand.hbm [shape: f32[4,8,512], index: 1, kind: input, shape index: {}]   ;;  %s3937_s2 = inlined_call_operand.hbm [shape: bf16[512,512], index: 2, kind: input, shape index: {}]   ;;  %s3938_s3 = inlined_call_operand.vmem [shape: f32[1,512], index: 3, kind: input, shape index: {}]   ;;  %s3939_s4 = inlined_call_operand.hbm [shape: bf16[512,512], index: 4, kind: input, shape index: {}]   ;;  %s3940_s5 = inlined_call_operand.vmem [shape: f32[1,512], index: 5, kind: input, shape index: {}]   ;;  %s3941_s6 = inlined_call_operand.vmem [shape: f32[4,8,1], index: 6, kind: output, shape index: {0}]   ;;  %s3942_s7 = inlined_call_operand.hbm [shape: f32[4,1,512], index: 7, kind: output, shape index: {1}]  }
   0x1   :  { %3947 = sst [smem:[#allocation16_spill]] %s3935_s0 }
   0x2   :  { %3948 = sst [smem:[#allocation17_spill]] %s3937_s2 }
   0x3   :  { %3949 = sst [smem:[#allocation18_spill]] %s3939_s4 }
   0x4   :  { %13 = vsyncpa [#allocation3], 0 }
   0x5   :  { %15 = vsyncpa [#allocation3 + $0x1], 0 }
   0x6   :  { %16 = vsyncpa [#allocation6], 0 }
   0x7   :  { %18 = vsyncpa [#allocation6 + $0x1], 0 }
   0x8   :  { %19 = vsyncpa [#allocation9], 0 }
   0x9   :  { %20 = vsyncpa [#allocation4], 0 }
   0xa   :  { %22 = vsyncpa [#allocation4 + $0x1], 0  ;;  %s3592_s24 = smov 0   ;;  %s3594_s25 = smov 0  }
   0xb   :  { %s3596_s26 = smov 0   ;;  %s3598_s27 = smov 0  }
   0xc LB: > { %s3613_s28 = sadd.s32 4294967295, %s3542_s27   ;;  %s2579_s29 = sadd.s32 4294967294, %s3542_s27   ;;  %s3542_s27 = sphi %s3598_s27, %s3972_s27   ;;  %s3538_s26 = sphi %s3596_s26, %s3971_s26   ;;  %s3534_s25 = sphi %s3594_s25, %s3970_s25   ;;  %s3530_s24 = sphi %s3592_s24, %s3969_s24  }
   0xd   : > { %p48_p0 = scmp.ne.s32.totalorder %s3534_s25, %s3530_s24  ;;  %p3943_p1 = scmp.eq.s32.totalorder %s3613_s28, 0 }
   0xe   : > { %p214_p3 = scmp.eq.s32.totalorder %s2579_s29, 3  ;;  %p2580_p5 = scmp.ge.s32.totalorder %s3542_s27, 1 }
   0xf   : > { %p3622_p4 = por %p3943_p1, %p48_p0  ;;  %p221_p7 = scmp.lt.s32.totalorder %s3542_s27, 5 }
  0x10   : > { %p3627_p6 = por %p214_p3, %p48_p0  ;;  %s3544_s10 = smov [#allocation7]  }
  0x11   : > { %s3950_s30 = scalar_select %p3622_p4, 1, 0 }
  0x12   : > { %s3951_s8 = scalar_select %p3627_p6, 1, 0 }
  0x13   : > { %p3632_p8 = pnand %p2580_p5, %p221_p7  ;;  %s233_s11 = sshll.u32 %s3544_s10, 4  ;;  %s234_s11 = int_to_ptr.vmem [resolvable:$true] %s233_s11 }
  0x14   : > { %s3545_s13 = smov [#allocation8]   ;;  %s3954_s2 = sld [smem:[#allocation17_spill]] }
  0x15   : > { %s3952_s9 = scalar_select %p3632_p8, 1, 0 }
  0x16   : > { %p2899_p9 = pneg %p3632_p8  ;;  %s249_s14 = sshll.u32 %s3545_s13, 4  ;;  %s3644_s14 = int_to_ptr.vmem [resolvable:$true] %s249_s14 }
  0x18   : > { %p3640_p10 = pnand %p2899_p9, %p3943_p1 }
  0x1a   : > { %s3348_s17 = scalar_lea.hbm %s3954_s2, 16384  ;;  %p3350_p12 = pneg %p3640_p10 }
  0x1b   : > { %p3349_p11 = scmp.ne.s32.totalorder %s3954_s2, %s3348_s17  ;;  %p3355_p3 = scmp.lt.u32.totalorder %s3348_s17, %s3954_s2 }
  0x1d   : > { %p3351_p13 = pnand %p3350_p12, %p3349_p11 }
  0x1f   : > { %p3352_p0 = pneg %p3351_p13 }
  0x21   : > { %p3357_p5 = pnand %p3355_p3, %p3352_p0 }
  0x23   : > { %3360 = shalt.err (!%p3357_p5)
}
  0x24   : > { %s3361_s22 = scalar_lea.vmem %s234_s11, 16384  ;;  %p3369_p2 = scmp.lt.s32.totalorder %s234_s11, %s234_s11 }
  0x25   : > { %p3362_p7 = scmp.ne.s32.totalorder %s234_s11, %s3361_s22  ;;  %p3370_p6 = scmp.lt.s32.totalorder %s3361_s22, %s3361_s22 }
  0x27   : > { %p3364_p9 = pnand %p3362_p7, %p3350_p12  ;;  %p3371_p4 = por %p3370_p6, %p3369_p2 }
  0x29   : > { %p3365_p1 = pneg %p3364_p9 }
  0x2b   : > { %p3372_p8 = pnand %p3371_p4, %p3365_p1 }
  0x2d   : > { %3375 = shalt.err (!%p3372_p8)
}
  0x2e   : > { %s3546_s23 = smov 256   ;;  %s3547_s29 = smov 16  }
  0x2f   : > { %2902 = dma.hbm_to_vmem [thread:$0]  (!%p3640_p10), %s3954_s2, 16384, %s234_s11, [#allocation6], %s3546_s23, %s3546_s23, %s3547_s29  }
  0x30   : > { %s3955_s4 = sld [smem:[#allocation18_spill]] }
  0x36   : > { %s3376_s17 = scalar_lea.hbm %s3955_s4, 16384 }
  0x37   : > { %p3377_p11 = scmp.ne.s32.totalorder %s3955_s4, %s3376_s17  ;;  %p3383_p4 = scmp.lt.u32.totalorder %s3376_s17, %s3955_s4 }
  0x39   : > { %p3379_p1 = pnand %p3377_p11, %p3350_p12 }
  0x3b   : > { %p3380_p2 = pneg %p3379_p1 }
  0x3d   : > { %p3385_p6 = pnand %p3383_p4, %p3380_p2 }
  0x3f   : > { %3388 = shalt.err (!%p3385_p6)
}
  0x40   : > { %s3389_s11 = scalar_lea.vmem %s3644_s14, 16384  ;;  %p3397_p3 = scmp.lt.s32.totalorder %s3644_s14, %s3644_s14 }
  0x41   : > { %p3390_p8 = scmp.ne.s32.totalorder %s3644_s14, %s3389_s11  ;;  %p3398_p5 = scmp.lt.s32.totalorder %s3389_s11, %s3389_s11 }
  0x43   : > { %p3392_p13 = pnand %p3390_p8, %p3350_p12  ;;  %p3399_p7 = por %p3398_p5, %p3397_p3 }
  0x45   : > { %p3393_p0 = pneg %p3392_p13 }
  0x47   : > { %p3400_p9 = pnand %p3399_p7, %p3393_p0 }
  0x49   : > { %3403 = shalt.err (!%p3400_p9)
}
  0x4a   : > { %2905 = dma.hbm_to_vmem [thread:$0]  (!%p3640_p10), %s3955_s4, 16384, %s3644_s14, [#allocation9], %s3546_s23, %s3546_s23, %s3547_s29  }
  0x4b   : > { %s3694_s13 = sadd.s32 1, %s3542_s27   ;;  %s35_s12 = sadd.s32 1, %s3538_s26 }
  0x4c   : > { %s32_s15 = ssub.s32 %s3542_s27, %s3694_s13  ;;  %p42_p12 = scmp.ne.s32.totalorder %s3538_s26, %s3534_s25 }
  0x4d   : > { %p33_p11 = scmp.eq.s32.totalorder %s32_s15, 0  ;;  %p43_p1 = scmp.eq.s32.totalorder %s3542_s27, 0 }
  0x4e   : > { %p3956_p2 = scmp.eq.s32.totalorder %s3613_s28, 3  ;;  %p2919_p6 = scmp.lt.s32.totalorder %s3542_s27, 4 }
  0x4f   : > { %s3710_s17 = scalar_select %p33_p11, %s3538_s26, %s35_s12  }
  0x50   : > { %p3704_p4 = por %p3956_p2, %p42_p12  ;;  %p44_p8 = por %p43_p1, %p42_p12 }
  0x51   : > { %s3713_s18 = sand.u32 1, %s3538_s26   ;;  %s2858_s23 = sshll.u32 %s3542_s27, 6 }
  0x52   : > { %s3957_s16 = scalar_select %p3704_p4, 1, 0 }
  0x53   : > { %s2584_s14 = sshll.u32 %s3713_s18, 2  ;;  %s3958_s0 = sld [smem:[#allocation16_spill]] }
  0x54   : > { %s270_s21 = scalar_lea.vmem [#allocation2], %s2584_s14  ;;  %p3724_p10 = pnand %p2919_p6, %p44_p8 }
  0x55   : > { %s278_s11 = sshll.u32 %s270_s21, 4  ;;  %s2587_s12 = sshll.u32 %s3713_s18, 5  ;;  %s3722_s11 = int_to_ptr.vmem [resolvable:$true] %s278_s11 }
  0x56   : > { %s267_s15 = scalar_lea.sflag [#allocation3], %s3713_s18  ;;  %p3406_p0 = pneg %p3724_p10 }
  0x59   : > { %s3720_s20 = scalar_lea.hbm %s3958_s0, %s2858_s23  ;;  %s3409_s19 = scalar_lea.hbm %s3958_s0, 256 }
  0x5a   : > { %s3404_s29 = scalar_lea.hbm %s3720_s20, 64  ;;  %p3410_p7 = scmp.lt.u32.totalorder %s3720_s20, %s3958_s0 }
  0x5b   : > { %p3405_p13 = scmp.ne.s32.totalorder %s3720_s20, %s3404_s29  ;;  %p3411_p9 = scmp.lt.u32.totalorder %s3409_s19, %s3404_s29 }
  0x5c   : > { %p3413_p11 = scmp.lt.u32.totalorder %s3404_s29, %s3720_s20 }
  0x5d   : > { %p3407_p3 = pnand %p3406_p0, %p3405_p13  ;;  %p3412_p12 = por %p3411_p9, %p3410_p7 }
  0x5f   : > { %p3408_p5 = pneg %p3407_p3  ;;  %p3414_p1 = por %p3413_p11, %p3412_p12 }
  0x61   : > { %p3415_p2 = pnand %p3414_p1, %p3408_p5 }
  0x63   : > { %3418 = shalt.err (!%p3415_p2)
}
  0x64   : > { %s3419_s10 = scalar_lea.vmem %s3722_s11, 64  ;;  %s3548_s14 = smov [#allocation2]  }
  0x65   : > { %p3420_p6 = scmp.ne.s32.totalorder %s3722_s11, %s3419_s10  ;;  %s3424_s23 = sshll.u32 %s3548_s14, 4  ;;  %s3425_s23 = int_to_ptr.vmem [resolvable:$false] %s3424_s23 }
  0x66   : > { %s3426_s2 = scalar_lea.vmem %s3425_s23, 128  ;;  %p3427_p3 = scmp.lt.s32.totalorder %s3722_s11, %s3425_s23 }
  0x67   : > { %p3422_p8 = pnand %p3420_p6, %p3406_p0  ;;  %p3428_p7 = scmp.lt.s32.totalorder %s3426_s2, %s3419_s10 }
  0x69   : > { %p3423_p13 = pneg %p3422_p8  ;;  %p3429_p9 = por %p3428_p7, %p3427_p3 }
  0x6b   : > { %p3430_p12 = pnand %p3429_p9, %p3423_p13 }
  0x6d   : > { %3433 = shalt.err (!%p3430_p12)
}
  0x6e   : > { %2909 = dma.hbm_to_vmem [thread:$0]  (!%p3724_p10), %s3720_s20, 64, %s3722_s11, %s267_s15  }
  0x6f   : > { %s2859_s29 = sshll.u32 %s3542_s27, 9  ;;  %s289_s10 = scalar_lea.vmem [#allocation5], %s2587_s12 }
  0x70   : > { %s3760_s14 = scalar_lea.hbm %s3936_s1, %s2859_s29  ;;  %s297_s23 = sshll.u32 %s289_s10, 4  ;;  %s298_s23 = int_to_ptr.vmem [resolvable:$true] %s297_s23 }
  0x71   : > { %s3960_s2 = sand.u32 1, %s3542_s27   ;;  %s3434_s4 = scalar_lea.hbm %s3760_s14, 512 }
  0x72   : > { %s286_s0 = scalar_lea.sflag [#allocation6], %s3960_s2  ;;  %p3435_p5 = scmp.ne.s32.totalorder %s3760_s14, %s3434_s4 }
  0x73   : > { %s3439_s15 = scalar_lea.hbm %s3936_s1, 2048  ;;  %p3440_p2 = scmp.lt.u32.totalorder %s3760_s14, %s3936_s1 }
  0x74   : > { %p3437_p11 = pnand %p3435_p5, %p3406_p0  ;;  %p3441_p6 = scmp.lt.u32.totalorder %s3439_s15, %s3434_s4 }
  0x75   : > { %p3443_p13 = scmp.lt.u32.totalorder %s3434_s4, %s3760_s14 }
  0x76   : > { %p3438_p1 = pneg %p3437_p11  ;;  %p3442_p8 = por %p3441_p6, %p3440_p2 }
  0x78   : > { %p3444_p3 = por %p3443_p13, %p3442_p8 }
  0x7a   : > { %p3445_p7 = pnand %p3444_p3, %p3438_p1 }
  0x7c   : > { %3448 = shalt.err (!%p3445_p7)
}
  0x7d   : > { %s3449_s12 = scalar_lea.vmem %s298_s23, 512  ;;  %s3549_s19 = smov [#allocation5]  }
  0x7e   : > { %p3450_p9 = scmp.ne.s32.totalorder %s298_s23, %s3449_s12  ;;  %s3454_s21 = sshll.u32 %s3549_s19, 4  ;;  %s3455_s21 = int_to_ptr.vmem [resolvable:$false] %s3454_s21 }
  0x7f   : > { %s3456_s10 = scalar_lea.vmem %s3455_s21, 1024  ;;  %p3457_p11 = scmp.lt.s32.totalorder %s298_s23, %s3455_s21 }
  0x80   : > { %p3452_p12 = pnand %p3450_p9, %p3406_p0  ;;  %p3458_p4 = scmp.lt.s32.totalorder %s3456_s10, %s3449_s12 }
  0x82   : > { %p3453_p5 = pneg %p3452_p12  ;;  %p3459_p2 = por %p3458_p4, %p3457_p11 }
  0x84   : > { %p3460_p6 = pnand %p3459_p2, %p3453_p5 }
  0x86   : > { %3463 = shalt.err (!%p3460_p6)
}
  0x87   : > { %2912 = dma.hbm_to_vmem [thread:$0]  (!%p3724_p10), %s3760_s14, 512, %s298_s23, %s286_s0  }
  0x88   : > { %p3961_p1 = scmp.ne.s32.totalorder %s3952_s9, 0 }
  0x89   : > { %s3788_s4 = sand.u32 (!%p3961_p1), 1, %s3534_s25   ;;  %p3962_p4 = scmp.ne.s32.totalorder (!%p3961_p1), %s3950_s30, 0 }
  0x8a   : > { %306 = sbr.rel (%p3961_p1) target bundleno = 740 (0x2e4), region = 44  ;;  %s2591_s2 = sshll.u32 (!%p3961_p1), %s3788_s4, 2 }
  0x8b   : > { %s309_s20 = scalar_lea.sflag (!%p3961_p1), [#allocation3], %s3788_s4  ;;  %s3794_s11 = scalar_lea.vmem (!%p3961_p1), [#allocation2], %s2591_s2 }
  0x91   : > { %3509 = dma.done.wait (%p3962_p4), %s309_s20, 64  }
  0x92   : > { %3511 = vsyncadd (%p3962_p4), %s309_s20, 4294967232  ;;  %s317_s0 = sand.u32 1, %s3613_s28   ;;  %s2592_s9 = sshll.u32 %s3788_s4, 5 }
  0x93   : > { %s318_s22 = scalar_lea.sflag [#allocation6], %s317_s0  ;;  %s3802_s14 = scalar_lea.vmem [#allocation5], %s2592_s9 }
  0x94   : > { %3513 = dma.done.wait (%p3962_p4), %s318_s22, 512  }
  0x95   : > { %3515 = vsyncadd (%p3962_p4), %s318_s22, 4294966784  ;;  %p3963_p10 = scmp.eq.s32.totalorder %s3613_s28, 0 }
  0x97   : > { %3517 = dma.done.wait (%p3963_p10), [#allocation6], 16384   ;;  %p3964_p0 = pmov %p3963_p10 }
  0x99   : > { %3519 = vsyncadd (%p3964_p0), [#allocation6], 4294950912  ;;  %p3965_p8 = pmov %p3964_p0 }
  0x9a   : > { %p3966_p13 = pmov %p3964_p0 }
  0x9b   : > { %3521 = dma.done.wait (%p3965_p8), [#allocation9], 16384  }
  0x9c   : > { %3523 = vsyncadd (%p3966_p13), [#allocation9], 4294950912  ;;  %v2960_v0 = vld [vmem:[#allocation7 + $0x4] ss:$16 sps:$4 sm:$0xff]   ;;  %v2962_v1 = vld [vmem:[#allocation7 + $0xc] ss:$16 sps:$4 sm:$0xff]   ;;  %v379_v36 = vlaneseq }
  0x9d   : > { %1193 = vmatprep.subr.bf16.mxu0 %v2960_v0  ;;  %v2964_v2 = vld [vmem:[#allocation7] ss:$16 sps:$4 sm:$0xff]   ;;  %v2965_v3 = vld [vmem:[#allocation7 + $0x8] ss:$16 sps:$4 sm:$0xff]   ;;  %1275 = vmatprep.subr.bf16.mxu1 %v2962_v1  ;;  %v2966_v4 = vld [vmem:[#allocation7 + $0x24] ss:$16 sps:$4 sm:$0xff]  }
  0x9e   : > { %1194 = vmatpush1.bf16.msra.mxu0 %v2964_v2  ;;  %1276 = vmatpush1.bf16.msra.mxu1 %v2965_v3  ;;  %v2968_v5 = vld [vmem:[#allocation7 + $0x2c] ss:$16 sps:$4 sm:$0xff]   ;;  %v2970_v6 = vld [vmem:[#allocation7 + $0x20] ss:$16 sps:$4 sm:$0xff]   ;;  %v2971_v7 = vld [vmem:[#allocation7 + $0x28] ss:$16 sps:$4 sm:$0xff]  }
  0x9f   : > { %1195 = vmatprep.subr.bf16.mxu0 %v2966_v4  ;;  %1277 = vmatprep.subr.bf16.mxu1 %v2968_v5  ;;  %v2972_v8 = vld [vmem:[#allocation7 + $0x44] ss:$16 sps:$4 sm:$0xff]   ;;  %v2974_v9 = vld [vmem:[#allocation7 + $0x4c] ss:$16 sps:$4 sm:$0xff]   ;;  %v2976_v10 = vld [vmem:[#allocation7 + $0x40] ss:$16 sps:$4 sm:$0xff]  }
  0xa0   : > { %v2977_v11 = vld [vmem:[#allocation7 + $0x48] ss:$16 sps:$4 sm:$0xff]   ;;  %v2978_v12 = vld [vmem:[#allocation7 + $0x64] ss:$16 sps:$4 sm:$0xff]   ;;  %v2980_v13 = vld [vmem:[#allocation7 + $0x6c] ss:$16 sps:$4 sm:$0xff]  }
  0xa1   : > { %v2982_v14 = vld [vmem:[#allocation7 + $0x60] ss:$16 sps:$4 sm:$0xff]   ;;  %v2983_v15 = vld [vmem:[#allocation7 + $0x68] ss:$16 sps:$4 sm:$0xff]   ;;  %v2984_v16 = vld [vmem:[#allocation7 + $0x84] ss:$16 sps:$4 sm:$0xff]  }
  0xa2   : > { %1196 = vmatpush1.bf16.msra.mxu0 %v2970_v6  ;;  %1278 = vmatpush1.bf16.msra.mxu1 %v2971_v7  ;;  %v2986_v17 = vld [vmem:[#allocation7 + $0x8c] ss:$16 sps:$4 sm:$0xff]   ;;  %v2988_v18 = vld [vmem:[#allocation7 + $0x80] ss:$16 sps:$4 sm:$0xff]   ;;  %v2989_v19 = vld [vmem:[#allocation7 + $0x88] ss:$16 sps:$4 sm:$0xff]  }
  0xa3   : > { %1197 = vmatprep.subr.bf16.mxu0 %v2972_v8  ;;  %1279 = vmatprep.subr.bf16.mxu1 %v2974_v9  ;;  %v2990_v20 = vld [vmem:[#allocation7 + $0xa4] ss:$16 sps:$4 sm:$0xff]   ;;  %v2992_v21 = vld [vmem:[#allocation7 + $0xac] ss:$16 sps:$4 sm:$0xff]   ;;  %v2994_v22 = vld [vmem:[#allocation7 + $0xa0] ss:$16 sps:$4 sm:$0xff]  }
  0xa4   : > { %v2995_v23 = vld [vmem:[#allocation7 + $0xa8] ss:$16 sps:$4 sm:$0xff]   ;;  %v2996_v24 = vld [vmem:[#allocation7 + $0xc4] ss:$16 sps:$4 sm:$0xff]   ;;  %v2998_v25 = vld [vmem:[#allocation7 + $0xcc] ss:$16 sps:$4 sm:$0xff]  }
  0xa5   : > { %v3000_v26 = vld [vmem:[#allocation7 + $0xc0] ss:$16 sps:$4 sm:$0xff]   ;;  %v3001_v27 = vld [vmem:[#allocation7 + $0xc8] ss:$16 sps:$4 sm:$0xff]   ;;  %v3002_v28 = vld [vmem:[#allocation7 + $0xe4] ss:$16 sps:$4 sm:$0xff]  }
  0xa6   : > { %1198 = vmatpush1.bf16.msra.mxu0 %v2976_v10  ;;  %1280 = vmatpush1.bf16.msra.mxu1 %v2977_v11  ;;  %v3004_v29 = vld [vmem:[#allocation7 + $0xec] ss:$16 sps:$4 sm:$0xff]   ;;  %v3006_v30 = vld [vmem:[#allocation7 + $0xe0] ss:$16 sps:$4 sm:$0xff]   ;;  %v3007_v31 = vld [vmem:[#allocation7 + $0xe8] ss:$16 sps:$4 sm:$0xff]  }
  0xa7   : > { %1199 = vmatprep.subr.bf16.mxu0 %v2978_v12  ;;  %1281 = vmatprep.subr.bf16.mxu1 %v2980_v13  ;;  %v3008_v32 = vld [vmem:[#allocation7 + $0x104] ss:$16 sps:$4 sm:$0xff]   ;;  %v3010_v33 = vld [vmem:[#allocation7 + $0x10c] ss:$16 sps:$4 sm:$0xff]   ;;  %v3012_v34 = vld [vmem:[#allocation7 + $0x100] ss:$16 sps:$4 sm:$0xff]  }
  0xa8   : > { %v3013_v35 = vld [vmem:[#allocation7 + $0x108] ss:$16 sps:$4 sm:$0xff]   ;;  %v3014_v37 = vld [vmem:[#allocation7 + $0x124] ss:$16 sps:$4 sm:$0xff]   ;;  %v3016_v38 = vld [vmem:[#allocation7 + $0x12c] ss:$16 sps:$4 sm:$0xff]  }
  0xa9   : > { %v3018_v39 = vld [vmem:[#allocation7 + $0x120] ss:$16 sps:$4 sm:$0xff]   ;;  %v3817_v40 = vshrl.u32 %v379_v36, 7  ;;  %v3019_v41 = vld [vmem:[#allocation7 + $0x128] ss:$16 sps:$4 sm:$0xff]   ;;  %p369_p3 = scmp.lt.s32.totalorder %s3613_s28, 3 }
  0xaa   : > { %1200 = vmatpush1.bf16.msra.mxu0 %v2982_v14  ;;  %1282 = vmatpush1.bf16.msra.mxu1 %v2983_v15  ;;  %v3020_v42 = vld [vmem:[#allocation7 + $0x144] ss:$16 sps:$4 sm:$0xff]   ;;  %v3022_v43 = vld [vmem:[#allocation7 + $0x14c] ss:$16 sps:$4 sm:$0xff]   ;;  %v3024_v44 = vld [vmem:[#allocation7 + $0x140] ss:$16 sps:$4 sm:$0xff]  }
  0xab   : > { %1201 = vmatprep.subr.bf16.mxu0 %v2984_v16  ;;  %1283 = vmatprep.subr.bf16.mxu1 %v2986_v17  ;;  %v3025_v45 = vld [vmem:[#allocation7 + $0x148] ss:$16 sps:$4 sm:$0xff]   ;;  %v3820_v46 = vsub.s32 1, %v3817_v40  ;;  %v3026_v47 = vld [vmem:[#allocation7 + $0x164] ss:$16 sps:$4 sm:$0xff]   ;;  %v3828_v1 = vsub.s32 0, %v3817_v40 }
  0xac   : > { %v3028_v48 = vld [vmem:[#allocation7 + $0x16c] ss:$16 sps:$4 sm:$0xff]   ;;  %v3030_v50 = vld [vmem:[#allocation7 + $0x160] ss:$16 sps:$4 sm:$0xff]   ;;  %v3031_v52 = vld [vmem:[#allocation7 + $0x168] ss:$16 sps:$4 sm:$0xff]  }
  0xad   : > { %v3823_v49 = vld [vmem:[%s3794_s11] sm:$0xf]  ;;  %v3032_v53 = vld [vmem:[#allocation7 + $0x184] ss:$16 sps:$4 sm:$0xff]   ;;  %v3036_v56 = vld [vmem:[#allocation7 + $0x180] ss:$16 sps:$4 sm:$0xff]  }
  0xae   : > { %1202 = vmatpush1.bf16.msra.mxu0 %v2988_v18  ;;  %1284 = vmatpush1.bf16.msra.mxu1 %v2989_v19  ;;  %v386_v51 = vrot.slane %v3823_v49, %v3820_v46  ;;  %v3034_v54 = vld [vmem:[#allocation7 + $0x18c] ss:$16 sps:$4 sm:$0xff]   ;;  %v3037_v57 = vld [vmem:[#allocation7 + $0x188] ss:$16 sps:$4 sm:$0xff]   ;;  %v3038_v58 = vld [vmem:[#allocation7 + $0x1a4] ss:$16 sps:$4 sm:$0xff]   ;;  %v382_v7 = vrot.slane %v3823_v49, %v3828_v1 }
  0xaf   : > { %1203 = vmatprep.subr.bf16.mxu0 %v2990_v20  ;;  %1285 = vmatprep.subr.bf16.mxu1 %v2992_v21  ;;  %v3040_v59 = vld [vmem:[#allocation7 + $0x1ac] ss:$16 sps:$4 sm:$0xff]   ;;  %v3042_v60 = vld [vmem:[#allocation7 + $0x1a0] ss:$16 sps:$4 sm:$0xff]   ;;  %v3043_v61 = vld [vmem:[#allocation7 + $0x1a8] ss:$16 sps:$4 sm:$0xff]  }
  0xb0   : > { %v400_v55 = vpack.c.bf16 %v386_v51, %v386_v51  ;;  %v3044_v62 = vld [vmem:[#allocation7 + $0x1c4] ss:$16 sps:$4 sm:$0xff]   ;;  %v3046_v63 = vld [vmem:[#allocation7 + $0x1cc] ss:$16 sps:$4 sm:$0xff]   ;;  %v3048_v0 = vld [vmem:[#allocation7 + $0x1c0] ss:$16 sps:$4 sm:$0xff]   ;;  %v399_v13 = vpack.c.bf16 %v382_v7, %v382_v7 }
  0xb1   : > { %v3049_v2 = vld [vmem:[#allocation7 + $0x1c8] ss:$16 sps:$4 sm:$0xff]   ;;  %v3050_v3 = vld [vmem:[#allocation7 + $0x1e4] ss:$16 sps:$4 sm:$0xff]   ;;  %v3052_v4 = vld [vmem:[#allocation7 + $0x1ec] ss:$16 sps:$4 sm:$0xff]  }
  0xb2   : > { %1204 = vmatpush1.bf16.msra.mxu0 %v2994_v22  ;;  %1286 = vmatpush1.bf16.msra.mxu1 %v2995_v23  ;;  %v3831_v5 = vsub.s32 3, %v3817_v40  ;;  %v3054_v6 = vld [vmem:[#allocation7 + $0x1e0] ss:$16 sps:$4 sm:$0xff]   ;;  %v3055_v8 = vld [vmem:[#allocation7 + $0x1e8] ss:$16 sps:$4 sm:$0xff]   ;;  %s370_s29 = scalar_select %p369_p3, %s3613_s28, 3 }
  0xb3   : > { %1205 = vmatprep.subr.bf16.mxu0 %v2996_v24  ;;  %1287 = vmatprep.subr.bf16.mxu1 %v2998_v25  ;;  %v3058_v9 = vld [vmem:[#allocation7 + $0x204] ss:$16 sps:$4 sm:$0xff]   ;;  %v3061_v10 = vld [vmem:[#allocation7 + $0x20c] ss:$16 sps:$4 sm:$0xff]   ;;  %v3056_v12 = vld [vmem:[#allocation7 + $0x200] ss:$16 sps:$4 sm:$0xff]  }
  0xb4   : > { %1225 = vmatprep.mubr.bf16.mxu0 %v400_v55  ;;  %1307 = vmatprep.mubr.bf16.mxu1 %v400_v55  ;;  %v394_v11 = vrot.slane %v3823_v49, %v3831_v5  ;;  %v3059_v14 = vld [vmem:[#allocation7 + $0x208] ss:$16 sps:$4 sm:$0xff]   ;;  %v3064_v15 = vld [vmem:[#allocation7 + $0x224] ss:$16 sps:$4 sm:$0xff]   ;;  %v3067_v16 = vld [vmem:[#allocation7 + $0x22c] ss:$16 sps:$4 sm:$0xff]  }
  0xb5   : > { %v3062_v18 = vld [vmem:[#allocation7 + $0x220] ss:$16 sps:$4 sm:$0xff]   ;;  %v3065_v19 = vld [vmem:[#allocation7 + $0x228] ss:$16 sps:$4 sm:$0xff]   ;;  %v3070_v20 = vld [vmem:[#allocation7 + $0x244] ss:$16 sps:$4 sm:$0xff]  }
  0xb6   : > { %1206 = vmatpush1.bf16.msra.mxu0 %v3000_v26  ;;  %1288 = vmatpush1.bf16.msra.mxu1 %v3001_v27  ;;  %v402_v17 = vpack.c.bf16 %v394_v11, %v394_v11  ;;  %v3073_v21 = vld [vmem:[#allocation7 + $0x24c] ss:$16 sps:$4 sm:$0xff]   ;;  %v3068_v22 = vld [vmem:[#allocation7 + $0x240] ss:$16 sps:$4 sm:$0xff]   ;;  %v3071_v23 = vld [vmem:[#allocation7 + $0x248] ss:$16 sps:$4 sm:$0xff]  }
  0xb7   : > { %1207 = vmatprep.subr.bf16.mxu0 %v3002_v28  ;;  %1289 = vmatprep.subr.bf16.mxu1 %v3004_v29  ;;  %v3076_v24 = vld [vmem:[#allocation7 + $0x264] ss:$16 sps:$4 sm:$0xff]   ;;  %v3079_v25 = vld [vmem:[#allocation7 + $0x26c] ss:$16 sps:$4 sm:$0xff]   ;;  %v3074_v26 = vld [vmem:[#allocation7 + $0x260] ss:$16 sps:$4 sm:$0xff]  }
  0xb8   : > { %v3077_v27 = vld [vmem:[#allocation7 + $0x268] ss:$16 sps:$4 sm:$0xff]   ;;  %v3082_v28 = vld [vmem:[#allocation7 + $0x284] ss:$16 sps:$4 sm:$0xff]   ;;  %v3085_v29 = vld [vmem:[#allocation7 + $0x28c] ss:$16 sps:$4 sm:$0xff]  }
  0xb9   : > { %v3107_v51 = vld [vmem:[#allocation7 + $0x308] ss:$16 sps:$4 sm:$0xff]   ;;  %v3139_v7 = vld [vmem:[#allocation7 + $0x3ac] ss:$16 sps:$4 sm:$0xff]   ;;  %s2596_s12 = sshll.u32 %s370_s29, 3  ;;  %vm2419_vm0 = vcmask 7168  }
  0xba   : > { %1208 = vmatpush1.bf16.msra.mxu0 %v3006_v30  ;;  %1290 = vmatpush1.bf16.msra.mxu1 %v3007_v31  ;;  %v3080_v30 = vld [vmem:[#allocation7 + $0x280] ss:$16 sps:$4 sm:$0xff]   ;;  %v3083_v31 = vld [vmem:[#allocation7 + $0x288] ss:$16 sps:$4 sm:$0xff]   ;;  %v3145_v11 = vld [vmem:[#allocation7 + $0x3cc] ss:$16 sps:$4 sm:$0xff]   ;;  %s372_s10 = scalar_lea.vmem %s3941_s6, %s2596_s12 }
  0xbb   : > { %1209 = vmatprep.subr.bf16.mxu0 %v3008_v32  ;;  %1291 = vmatprep.subr.bf16.mxu1 %v3010_v33  ;;  %v3088_v32 = vld [vmem:[#allocation7 + $0x2a4] ss:$16 sps:$4 sm:$0xff]   ;;  %v3091_v33 = vld [vmem:[#allocation7 + $0x2ac] ss:$16 sps:$4 sm:$0xff]   ;;  %v3113_v55 = vld [vmem:[#allocation7 + $0x328] ss:$16 sps:$4 sm:$0xff]  }
  0xbc   : > { %s2860_s20 = sshll.u32 %s3613_s28, 6  ;;  %s368_s11 = scalar_lea.vmem [#allocation10], %s2591_s2  ;;  %vm2416_vm1 = vcmp.lt.s32.totalorder %v379_v36, 512 }
  0xbd   : > { %s2443_s0 = sshll.u32 %s368_s11, 4  ;;  %s2426_s30 = scalar_lea.sflag [#allocation4], %s3788_s4  ;;  %s3894_s0 = int_to_ptr.vmem [resolvable:$true] %s2443_s0 }
  0xbe   : > { %1210 = vmatpush1.bf16.msra.mxu0 %v3012_v34  ;;  %1292 = vmatpush1.bf16.msra.mxu1 %v3013_v35  ;;  %v3086_v34 = vld [vmem:[#allocation7 + $0x2a0] ss:$16 sps:$4 sm:$0xff]   ;;  %v3089_v35 = vld [vmem:[#allocation7 + $0x2a8] ss:$16 sps:$4 sm:$0xff]   ;;  %s3464_s28 = scalar_lea.vmem %s3894_s0, 64  ;;  %p3967_p9 = scmp.ne.s32.totalorder %s3957_s16, 0 }
  0xbf   : > { %1211 = vmatprep.subr.bf16.mxu0 %v3014_v37  ;;  %1293 = vmatprep.subr.bf16.mxu1 %v3016_v38  ;;  %v3094_v37 = vld [vmem:[#allocation7 + $0x2c4] ss:$16 sps:$4 sm:$0xff]   ;;  %v3097_v38 = vld [vmem:[#allocation7 + $0x2cc] ss:$16 sps:$4 sm:$0xff]   ;;  %p3465_p7 = scmp.ne.s32.totalorder %s3894_s0, %s3464_s28  ;;  %s3551_s2 = smov [#allocation10]  }
  0xc0   : > { %s3468_s23 = sshll.u32 %s3551_s2, 4  ;;  %s3469_s23 = int_to_ptr.vmem [resolvable:$false] %s3468_s23 }
  0xc1   : > { %p3466_p12 = pnand %p3465_p7, %p3967_p9  ;;  %s3470_s15 = scalar_lea.vmem %s3469_s23, 128 }
  0xc2   : > { %1212 = vmatpush1.bf16.msra.mxu0 %v3018_v39  ;;  %1294 = vmatpush1.bf16.msra.mxu1 %v3019_v41  ;;  %v3092_v39 = vld [vmem:[#allocation7 + $0x2c0] ss:$16 sps:$4 sm:$0xff]   ;;  %v3095_v41 = vld [vmem:[#allocation7 + $0x2c8] ss:$16 sps:$4 sm:$0xff]   ;;  %p3471_p11 = scmp.lt.s32.totalorder %s3894_s0, %s3469_s23  ;;  %p3472_p2 = scmp.lt.s32.totalorder %s3470_s15, %s3464_s28 }
  0xc3   : > { %1213 = vmatprep.subr.bf16.mxu0 %v3020_v42  ;;  %1295 = vmatprep.subr.bf16.mxu1 %v3022_v43  ;;  %v3100_v42 = vld [vmem:[#allocation7 + $0x2e4] ss:$16 sps:$4 sm:$0xff]   ;;  %v3103_v43 = vld [vmem:[#allocation7 + $0x2ec] ss:$16 sps:$4 sm:$0xff]   ;;  %p3467_p5 = pneg %p3466_p12 }
  0xc4   : > { %p3473_p6 = por %p3472_p2, %p3471_p11 }
  0xc6   : > { %1214 = vmatpush1.bf16.msra.mxu0 %v3024_v44  ;;  %1296 = vmatpush1.bf16.msra.mxu1 %v3025_v45  ;;  %v3098_v44 = vld [vmem:[#allocation7 + $0x2e0] ss:$16 sps:$4 sm:$0xff]   ;;  %v3101_v45 = vld [vmem:[#allocation7 + $0x2e8] ss:$16 sps:$4 sm:$0xff]   ;;  %p3474_p1 = pnand %p3473_p6, %p3467_p5 }
  0xc7   : > { %1215 = vmatprep.subr.bf16.mxu0 %v3026_v47  ;;  %1297 = vmatprep.subr.bf16.mxu1 %v3028_v48  ;;  %v3106_v47 = vld [vmem:[#allocation7 + $0x304] ss:$16 sps:$4 sm:$0xff]   ;;  %v3109_v48 = vld [vmem:[#allocation7 + $0x30c] ss:$16 sps:$4 sm:$0xff]  }
  0xca   : > { %1216 = vmatpush1.bf16.msra.mxu0 %v3030_v50  ;;  %1298 = vmatpush1.bf16.msra.mxu1 %v3031_v52  ;;  %v3104_v50 = vld [vmem:[#allocation7 + $0x300] ss:$16 sps:$4 sm:$0xff]   ;;  %v3112_v52 = vld [vmem:[#allocation7 + $0x324] ss:$16 sps:$4 sm:$0xff]  }
  0xcb   : > { %1217 = vmatprep.subr.bf16.mxu0 %v3032_v53  ;;  %1299 = vmatprep.subr.bf16.mxu1 %v3034_v54  ;;  %v3115_v53 = vld [vmem:[#allocation7 + $0x32c] ss:$16 sps:$4 sm:$0xff]   ;;  %v3110_v54 = vld [vmem:[#allocation7 + $0x320] ss:$16 sps:$4 sm:$0xff]  }
  0xce   : > { %1218 = vmatpush1.bf16.msra.mxu0 %v3036_v56  ;;  %1300 = vmatpush1.bf16.msra.mxu1 %v3037_v57  ;;  %v3118_v56 = vld [vmem:[#allocation7 + $0x344] ss:$16 sps:$4 sm:$0xff]   ;;  %v3121_v57 = vld [vmem:[#allocation7 + $0x34c] ss:$16 sps:$4 sm:$0xff]  }
  0xcf   : > { %1219 = vmatprep.subr.bf16.mxu0 %v3038_v58  ;;  %1301 = vmatprep.subr.bf16.mxu1 %v3040_v59  ;;  %v3116_v58 = vld [vmem:[#allocation7 + $0x340] ss:$16 sps:$4 sm:$0xff]   ;;  %v3119_v59 = vld [vmem:[#allocation7 + $0x348] ss:$16 sps:$4 sm:$0xff]  }
  0xd2   : > { %1220 = vmatpush1.bf16.msra.mxu0 %v3042_v60  ;;  %1302 = vmatpush1.bf16.msra.mxu1 %v3043_v61  ;;  %v3124_v60 = vld [vmem:[#allocation7 + $0x364] ss:$16 sps:$4 sm:$0xff]   ;;  %v3127_v61 = vld [vmem:[#allocation7 + $0x36c] ss:$16 sps:$4 sm:$0xff]  }
  0xd3   : > { %1221 = vmatprep.subr.bf16.mxu0 %v3044_v62  ;;  %1303 = vmatprep.subr.bf16.mxu1 %v3046_v63  ;;  %v3122_v62 = vld [vmem:[#allocation7 + $0x360] ss:$16 sps:$4 sm:$0xff]   ;;  %v3125_v63 = vld [vmem:[#allocation7 + $0x368] ss:$16 sps:$4 sm:$0xff]  }
  0xd6   : > { %1222 = vmatpush1.bf16.msra.mxu0 %v3048_v0  ;;  %1304 = vmatpush1.bf16.msra.mxu1 %v3049_v2  ;;  %v3130_v0 = vld [vmem:[#allocation7 + $0x384] ss:$16 sps:$4 sm:$0xff]   ;;  %v3133_v2 = vld [vmem:[#allocation7 + $0x38c] ss:$16 sps:$4 sm:$0xff]  }
  0xd7   : > { %1223 = vmatprep.subr.bf16.mxu0 %v3050_v3  ;;  %1305 = vmatprep.subr.bf16.mxu1 %v3052_v4  ;;  %v3128_v3 = vld [vmem:[#allocation7 + $0x380] ss:$16 sps:$4 sm:$0xff]   ;;  %v3131_v4 = vld [vmem:[#allocation7 + $0x388] ss:$16 sps:$4 sm:$0xff]  }
  0xda   : > { %1224 = vmatpush1.bf16.msra.mxu0 %v3054_v6  ;;  %1306 = vmatpush1.bf16.msra.mxu1 %v3055_v8  ;;  %v3136_v6 = vld [vmem:[#allocation7 + $0x3a4] ss:$16 sps:$4 sm:$0xff]   ;;  %v3134_v8 = vld [vmem:[#allocation7 + $0x3a0] ss:$16 sps:$4 sm:$0xff]  }
  0xdb   : > { %1234 = vmatprep.subr.bf16.mxu0 %v3058_v9  ;;  %1316 = vmatprep.subr.bf16.mxu1 %v3061_v10  ;;  %v3137_v9 = vld [vmem:[#allocation7 + $0x3a8] ss:$16 sps:$4 sm:$0xff]   ;;  %v3142_v10 = vld [vmem:[#allocation7 + $0x3c4] ss:$16 sps:$4 sm:$0xff]  }
  0xdd   : > { %1226 = vmatmul.mubr.bf16.vlgmr.msra.gmra.mrb[0].mxu0 %v399_v13  ;;  %1308 = vmatmul.mubr.bf16.vlgmr.msra.gmra.mrb[0].mxu1 %v399_v13  ;;  %v3838_v13 = vsub.s32 2, %v3817_v40 }
  0xde   : > { %1235 = vmatpush1.bf16.msra.mxu0 %v3056_v12  ;;  %1317 = vmatpush1.bf16.msra.mxu1 %v3059_v14  ;;  %v3140_v12 = vld [vmem:[#allocation7 + $0x3c0] ss:$16 sps:$4 sm:$0xff]   ;;  %v3143_v14 = vld [vmem:[#allocation7 + $0x3c8] ss:$16 sps:$4 sm:$0xff]  }
  0xdf   : > { %1236 = vmatprep.subr.bf16.mxu0 %v3064_v15  ;;  %1318 = vmatprep.subr.bf16.mxu1 %v3067_v16  ;;  %v3148_v15 = vld [vmem:[#allocation7 + $0x3e4] ss:$16 sps:$4 sm:$0xff]   ;;  %v3151_v16 = vld [vmem:[#allocation7 + $0x3ec] ss:$16 sps:$4 sm:$0xff]  }
  0xe0   : > { %1266 = vmatprep.mubr.bf16.mxu0 %v402_v17  ;;  %1348 = vmatprep.mubr.bf16.mxu1 %v402_v17  ;;  %v3146_v17 = vld [vmem:[#allocation7 + $0x3e0] ss:$16 sps:$4 sm:$0xff]  }
  0xe2   : > { %1237 = vmatpush1.bf16.msra.mxu0 %v3062_v18  ;;  %1319 = vmatpush1.bf16.msra.mxu1 %v3065_v19  ;;  %v390_v18 = vrot.slane %v3823_v49, %v3838_v13  ;;  %v3149_v19 = vld [vmem:[#allocation7 + $0x3e8] ss:$16 sps:$4 sm:$0xff]  }
  0xe3   : > { %1238 = vmatprep.subr.bf16.mxu0 %v3070_v20  ;;  %1320 = vmatprep.subr.bf16.mxu1 %v3073_v21  ;;  %v3154_v20 = vld [vmem:[#allocation8 + $0x4] ss:$16 sps:$4 sm:$0xff]   ;;  %v3157_v21 = vld [vmem:[#allocation8 + $0xc] ss:$16 sps:$4 sm:$0xff]  }
  0xe6   : > { %1239 = vmatpush1.bf16.msra.mxu0 %v3068_v22  ;;  %1321 = vmatpush1.bf16.msra.mxu1 %v3071_v23  ;;  %v401_v22 = vpack.c.bf16 %v390_v18, %v390_v18  ;;  %v3152_v23 = vld [vmem:[#allocation8] ss:$16 sps:$4 sm:$0xff]   ;;  %v3235_v18 = vld [vmem:[#allocation8 + $0x1ac] ss:$16 sps:$4 sm:$0xff]  }
  0xe7   : > { %1240 = vmatprep.subr.bf16.mxu0 %v3076_v24  ;;  %1322 = vmatprep.subr.bf16.mxu1 %v3079_v25  ;;  %v3155_v24 = vld [vmem:[#allocation8 + $0x8] ss:$16 sps:$4 sm:$0xff]  }
  0xe8   : > { %v3843_v25 = vld [vmem:[%s3802_s14 + $0x8] sm:$0xff] }
  0xe9   : > { %v1358_v49 = vpack.c.bf16 %v3843_v25, %v3843_v25 }
  0xea   : > { %1241 = vmatpush1.bf16.msra.mxu0 %v3074_v26  ;;  %1323 = vmatpush1.bf16.msra.mxu1 %v3077_v27  ;;  %v3160_v26 = vld [vmem:[#allocation8 + $0x24] ss:$16 sps:$4 sm:$0xff]   ;;  %v3163_v27 = vld [vmem:[#allocation8 + $0x2c] ss:$16 sps:$4 sm:$0xff]  }
  0xeb   : > { %1242 = vmatprep.subr.bf16.mxu0 %v3082_v28  ;;  %1324 = vmatprep.subr.bf16.mxu1 %v3085_v29  ;;  %v3158_v28 = vld [vmem:[#allocation8 + $0x20] ss:$16 sps:$4 sm:$0xff]   ;;  %v3161_v29 = vld [vmem:[#allocation8 + $0x28] ss:$16 sps:$4 sm:$0xff]  }
  0xee   : > { %1243 = vmatpush1.bf16.msra.mxu0 %v3080_v30  ;;  %1325 = vmatpush1.bf16.msra.mxu1 %v3083_v31  ;;  %v3166_v30 = vld [vmem:[#allocation8 + $0x44] ss:$16 sps:$4 sm:$0xff]   ;;  %v3169_v31 = vld [vmem:[#allocation8 + $0x4c] ss:$16 sps:$4 sm:$0xff]  }
  0xef   : > { %1244 = vmatprep.subr.bf16.mxu0 %v3088_v32  ;;  %1326 = vmatprep.subr.bf16.mxu1 %v3091_v33  ;;  %v3164_v32 = vld [vmem:[#allocation8 + $0x40] ss:$16 sps:$4 sm:$0xff]   ;;  %v3167_v33 = vld [vmem:[#allocation8 + $0x48] ss:$16 sps:$4 sm:$0xff]  }
  0xf2   : > { %1245 = vmatpush1.bf16.msra.mxu0 %v3086_v34  ;;  %1327 = vmatpush1.bf16.msra.mxu1 %v3089_v35  ;;  %v3172_v34 = vld [vmem:[#allocation8 + $0x64] ss:$16 sps:$4 sm:$0xff]   ;;  %v3175_v35 = vld [vmem:[#allocation8 + $0x6c] ss:$16 sps:$4 sm:$0xff]  }
  0xf3   : > { %1246 = vmatprep.subr.bf16.mxu0 %v3094_v37  ;;  %1328 = vmatprep.subr.bf16.mxu1 %v3097_v38  ;;  %v3170_v37 = vld [vmem:[#allocation8 + $0x60] ss:$16 sps:$4 sm:$0xff]   ;;  %v3173_v38 = vld [vmem:[#allocation8 + $0x68] ss:$16 sps:$4 sm:$0xff]  }
  0xf6   : > { %1247 = vmatpush1.bf16.msra.mxu0 %v3092_v39  ;;  %1329 = vmatpush1.bf16.msra.mxu1 %v3095_v41  ;;  %v3178_v39 = vld [vmem:[#allocation8 + $0x84] ss:$16 sps:$4 sm:$0xff]   ;;  %v3181_v41 = vld [vmem:[#allocation8 + $0x8c] ss:$16 sps:$4 sm:$0xff]  }
  0xf7   : > { %1248 = vmatprep.subr.bf16.mxu0 %v3100_v42  ;;  %1330 = vmatprep.subr.bf16.mxu1 %v3103_v43  ;;  %v3176_v42 = vld [vmem:[#allocation8 + $0x80] ss:$16 sps:$4 sm:$0xff]   ;;  %v3179_v43 = vld [vmem:[#allocation8 + $0x88] ss:$16 sps:$4 sm:$0xff]  }
  0xfa   : > { %1249 = vmatpush1.bf16.msra.mxu0 %v3098_v44  ;;  %1331 = vmatpush1.bf16.msra.mxu1 %v3101_v45  ;;  %v3184_v44 = vld [vmem:[#allocation8 + $0xa4] ss:$16 sps:$4 sm:$0xff]   ;;  %v3187_v45 = vld [vmem:[#allocation8 + $0xac] ss:$16 sps:$4 sm:$0xff]  }
  0xfb   : > { %1250 = vmatprep.subr.bf16.mxu0 %v3106_v47  ;;  %1332 = vmatprep.subr.bf16.mxu1 %v3109_v48  ;;  %v3182_v47 = vld [vmem:[#allocation8 + $0xa0] ss:$16 sps:$4 sm:$0xff]   ;;  %v3185_v48 = vld [vmem:[#allocation8 + $0xa8] ss:$16 sps:$4 sm:$0xff]  }
  0xfe   : > { %1251 = vmatpush1.bf16.msra.mxu0 %v3104_v50  ;;  %1333 = vmatpush1.bf16.msra.mxu1 %v3107_v51  ;;  %v3190_v50 = vld [vmem:[#allocation8 + $0xc4] ss:$16 sps:$4 sm:$0xff]   ;;  %v3193_v51 = vld [vmem:[#allocation8 + $0xcc] ss:$16 sps:$4 sm:$0xff]  }
  0xff   : > { %1252 = vmatprep.subr.bf16.mxu0 %v3112_v52  ;;  %1334 = vmatprep.subr.bf16.mxu1 %v3115_v53  ;;  %v3188_v52 = vld [vmem:[#allocation8 + $0xc0] ss:$16 sps:$4 sm:$0xff]   ;;  %v3191_v53 = vld [vmem:[#allocation8 + $0xc8] ss:$16 sps:$4 sm:$0xff]  }
 0x102   : > { %1253 = vmatpush1.bf16.msra.mxu0 %v3110_v54  ;;  %1335 = vmatpush1.bf16.msra.mxu1 %v3113_v55  ;;  %v3196_v54 = vld [vmem:[#allocation8 + $0xe4] ss:$16 sps:$4 sm:$0xff]   ;;  %v3199_v55 = vld [vmem:[#allocation8 + $0xec] ss:$16 sps:$4 sm:$0xff]  }
 0x103   : > { %1254 = vmatprep.subr.bf16.mxu0 %v3118_v56  ;;  %1336 = vmatprep.subr.bf16.mxu1 %v3121_v57  ;;  %v3194_v56 = vld [vmem:[#allocation8 + $0xe0] ss:$16 sps:$4 sm:$0xff]   ;;  %v3197_v57 = vld [vmem:[#allocation8 + $0xe8] ss:$16 sps:$4 sm:$0xff]  }
 0x106   : > { %1255 = vmatpush1.bf16.msra.mxu0 %v3116_v58  ;;  %1337 = vmatpush1.bf16.msra.mxu1 %v3119_v59  ;;  %v3202_v58 = vld [vmem:[#allocation8 + $0x104] ss:$16 sps:$4 sm:$0xff]   ;;  %v3205_v59 = vld [vmem:[#allocation8 + $0x10c] ss:$16 sps:$4 sm:$0xff]  }
 0x107   : > { %1256 = vmatprep.subr.bf16.mxu0 %v3124_v60  ;;  %1338 = vmatprep.subr.bf16.mxu1 %v3127_v61  ;;  %v3200_v60 = vld [vmem:[#allocation8 + $0x100] ss:$16 sps:$4 sm:$0xff]   ;;  %v3203_v61 = vld [vmem:[#allocation8 + $0x108] ss:$16 sps:$4 sm:$0xff]  }
 0x10a   : > { %1257 = vmatpush1.bf16.msra.mxu0 %v3122_v62  ;;  %1339 = vmatpush1.bf16.msra.mxu1 %v3125_v63  ;;  %v3208_v62 = vld [vmem:[#allocation8 + $0x124] ss:$16 sps:$4 sm:$0xff]   ;;  %v3211_v63 = vld [vmem:[#allocation8 + $0x12c] ss:$16 sps:$4 sm:$0xff]  }
 0x10b   : > { %1258 = vmatprep.subr.bf16.mxu0 %v3130_v0  ;;  %1340 = vmatprep.subr.bf16.mxu1 %v3133_v2  ;;  %v3206_v0 = vld [vmem:[#allocation8 + $0x120] ss:$16 sps:$4 sm:$0xff]   ;;  %v3209_v2 = vld [vmem:[#allocation8 + $0x128] ss:$16 sps:$4 sm:$0xff]  }
 0x10e   : > { %1259 = vmatpush1.bf16.msra.mxu0 %v3128_v3  ;;  %1341 = vmatpush1.bf16.msra.mxu1 %v3131_v4  ;;  %v3214_v3 = vld [vmem:[#allocation8 + $0x144] ss:$16 sps:$4 sm:$0xff]   ;;  %v3217_v4 = vld [vmem:[#allocation8 + $0x14c] ss:$16 sps:$4 sm:$0xff]  }
 0x10f   : > { %1260 = vmatprep.subr.bf16.mxu0 %v3136_v6  ;;  %1342 = vmatprep.subr.bf16.mxu1 %v3139_v7  ;;  %v3212_v6 = vld [vmem:[#allocation8 + $0x140] ss:$16 sps:$4 sm:$0xff]   ;;  %v3215_v7 = vld [vmem:[#allocation8 + $0x148] ss:$16 sps:$4 sm:$0xff]  }
 0x112   : > { %1261 = vmatpush1.bf16.msra.mxu0 %v3134_v8  ;;  %1343 = vmatpush1.bf16.msra.mxu1 %v3137_v9  ;;  %v3220_v8 = vld [vmem:[#allocation8 + $0x164] ss:$16 sps:$4 sm:$0xff]   ;;  %v3223_v9 = vld [vmem:[#allocation8 + $0x16c] ss:$16 sps:$4 sm:$0xff]  }
 0x113   : > { %1262 = vmatprep.subr.bf16.mxu0 %v3142_v10  ;;  %1344 = vmatprep.subr.bf16.mxu1 %v3145_v11  ;;  %v3218_v10 = vld [vmem:[#allocation8 + $0x160] ss:$16 sps:$4 sm:$0xff]   ;;  %v3221_v11 = vld [vmem:[#allocation8 + $0x168] ss:$16 sps:$4 sm:$0xff]  }
 0x116   : > { %1263 = vmatpush1.bf16.msra.mxu0 %v3140_v12  ;;  %1345 = vmatpush1.bf16.msra.mxu1 %v3143_v14  ;;  %v3226_v12 = vld [vmem:[#allocation8 + $0x184] ss:$16 sps:$4 sm:$0xff]   ;;  %v3229_v14 = vld [vmem:[#allocation8 + $0x18c] ss:$16 sps:$4 sm:$0xff]  }
 0x117   : > { %1264 = vmatprep.subr.bf16.mxu0 %v3148_v15  ;;  %1346 = vmatprep.subr.bf16.mxu1 %v3151_v16  ;;  %v3224_v15 = vld [vmem:[#allocation8 + $0x180] ss:$16 sps:$4 sm:$0xff]   ;;  %v3227_v16 = vld [vmem:[#allocation8 + $0x188] ss:$16 sps:$4 sm:$0xff]  }
 0x11a   : > { %1265 = vmatpush1.bf16.msra.mxu0 %v3146_v17  ;;  %1347 = vmatpush1.bf16.msra.mxu1 %v3149_v19  ;;  %v3232_v17 = vld [vmem:[#allocation8 + $0x1a4] ss:$16 sps:$4 sm:$0xff]   ;;  %v3230_v19 = vld [vmem:[#allocation8 + $0x1a0] ss:$16 sps:$4 sm:$0xff]  }
 0x11b   : > { %2151 = vmatprep.subr.bf16.mxu0 %v3154_v20  ;;  %2233 = vmatprep.subr.bf16.mxu1 %v3157_v21  ;;  %v3233_v20 = vld [vmem:[#allocation8 + $0x1a8] ss:$16 sps:$4 sm:$0xff]   ;;  %v3238_v21 = vld [vmem:[#allocation8 + $0x1c4] ss:$16 sps:$4 sm:$0xff]  }
 0x11d   : > { %1267 = vmatmul.mubr.bf16.vlgmr.msra.gmra.mrb[0].mxu0 %v401_v22  ;;  %1349 = vmatmul.mubr.bf16.vlgmr.msra.gmra.mrb[0].mxu1 %v401_v22  ;;  %v3241_v22 = vld [vmem:[#allocation8 + $0x1cc] ss:$16 sps:$4 sm:$0xff]  }
 0x11e   : > { %2152 = vmatpush1.bf16.msra.mxu0 %v3152_v23  ;;  %2234 = vmatpush1.bf16.msra.mxu1 %v3155_v24  ;;  %v3236_v23 = vld [vmem:[#allocation8 + $0x1c0] ss:$16 sps:$4 sm:$0xff]   ;;  %v3239_v24 = vld [vmem:[#allocation8 + $0x1c8] ss:$16 sps:$4 sm:$0xff]  }
 0x11f   : > { %2153 = vmatprep.subr.bf16.mxu0 %v3160_v26  ;;  %2235 = vmatprep.subr.bf16.mxu1 %v3163_v27  ;;  %v3244_v26 = vld [vmem:[#allocation8 + $0x1e4] ss:$16 sps:$4 sm:$0xff]   ;;  %v3247_v27 = vld [vmem:[#allocation8 + $0x1ec] ss:$16 sps:$4 sm:$0xff]  }
 0x120   : > { %2183 = vmatprep.mubr.bf16.mxu0 %v1358_v49  ;;  %2265 = vmatprep.mubr.bf16.mxu1 %v1358_v49  ;;  %v3242_v49 = vld [vmem:[#allocation8 + $0x1e0] ss:$16 sps:$4 sm:$0xff]  }
 0x122   : > { %2154 = vmatpush1.bf16.msra.mxu0 %v3158_v28  ;;  %2236 = vmatpush1.bf16.msra.mxu1 %v3161_v29  ;;  %v3245_v28 = vld [vmem:[#allocation8 + $0x1e8] ss:$16 sps:$4 sm:$0xff]   ;;  %v3848_v29 = vld [vmem:[%s3802_s14] sm:$0xff] }
 0x123   : > { %2155 = vmatprep.subr.bf16.mxu0 %v3166_v30  ;;  %2237 = vmatprep.subr.bf16.mxu1 %v3169_v31  ;;  %v3250_v30 = vld [vmem:[#allocation8 + $0x204] ss:$16 sps:$4 sm:$0xff]   ;;  %v3253_v31 = vld [vmem:[#allocation8 + $0x20c] ss:$16 sps:$4 sm:$0xff]  }
 0x126   : > { %2156 = vmatpush1.bf16.msra.mxu0 %v3164_v32  ;;  %2238 = vmatpush1.bf16.msra.mxu1 %v3167_v33  ;;  %v1357_v32 = vpack.c.bf16 %v3848_v29, %v3848_v29  ;;  %v3853_v33 = vld [vmem:[%s3802_s14 + $0x18] sm:$0xff] }
 0x127   : > { %2157 = vmatprep.subr.bf16.mxu0 %v3172_v34  ;;  %2239 = vmatprep.subr.bf16.mxu1 %v3175_v35  ;;  %v3248_v34 = vld [vmem:[#allocation8 + $0x200] ss:$16 sps:$4 sm:$0xff]   ;;  %v3251_v35 = vld [vmem:[#allocation8 + $0x208] ss:$16 sps:$4 sm:$0xff]  }
 0x12a   : > { %2158 = vmatpush1.bf16.msra.mxu0 %v3170_v37  ;;  %2240 = vmatpush1.bf16.msra.mxu1 %v3173_v38  ;;  %v3256_v37 = vld [vmem:[#allocation8 + $0x224] ss:$16 sps:$4 sm:$0xff]   ;;  %v3259_v38 = vld [vmem:[#allocation8 + $0x22c] ss:$16 sps:$4 sm:$0xff]  }
 0x12b   : > { %2159 = vmatprep.subr.bf16.mxu0 %v3178_v39  ;;  %2241 = vmatprep.subr.bf16.mxu1 %v3181_v41  ;;  %v1360_v39 = vpack.c.bf16 %v3853_v33, %v3853_v33  ;;  %v3254_v41 = vld [vmem:[#allocation8 + $0x220] ss:$16 sps:$4 sm:$0xff]  }
 0x12e   : > { %2160 = vmatpush1.bf16.msra.mxu0 %v3176_v42  ;;  %2242 = vmatpush1.bf16.msra.mxu1 %v3179_v43  ;;  %v3257_v42 = vld [vmem:[#allocation8 + $0x228] ss:$16 sps:$4 sm:$0xff]   ;;  %v3262_v43 = vld [vmem:[#allocation8 + $0x244] ss:$16 sps:$4 sm:$0xff]  }
 0x12f   : > { %2161 = vmatprep.subr.bf16.mxu0 %v3184_v44  ;;  %2243 = vmatprep.subr.bf16.mxu1 %v3187_v45  ;;  %v3265_v44 = vld [vmem:[#allocation8 + $0x24c] ss:$16 sps:$4 sm:$0xff]   ;;  %v3260_v45 = vld [vmem:[#allocation8 + $0x240] ss:$16 sps:$4 sm:$0xff]  }
 0x132   : > { %2162 = vmatpush1.bf16.msra.mxu0 %v3182_v47  ;;  %2244 = vmatpush1.bf16.msra.mxu1 %v3185_v48  ;;  %v3263_v47 = vld [vmem:[#allocation8 + $0x248] ss:$16 sps:$4 sm:$0xff]   ;;  %v3268_v48 = vld [vmem:[#allocation8 + $0x264] ss:$16 sps:$4 sm:$0xff]  }
 0x133   : > { %2163 = vmatprep.subr.bf16.mxu0 %v3190_v50  ;;  %2245 = vmatprep.subr.bf16.mxu1 %v3193_v51  ;;  %v3271_v50 = vld [vmem:[#allocation8 + $0x26c] ss:$16 sps:$4 sm:$0xff]   ;;  %v3266_v51 = vld [vmem:[#allocation8 + $0x260] ss:$16 sps:$4 sm:$0xff]  }
 0x136   : > { %2164 = vmatpush1.bf16.msra.mxu0 %v3188_v52  ;;  %2246 = vmatpush1.bf16.msra.mxu1 %v3191_v53  ;;  %v3269_v52 = vld [vmem:[#allocation8 + $0x268] ss:$16 sps:$4 sm:$0xff]   ;;  %v3274_v53 = vld [vmem:[#allocation8 + $0x284] ss:$16 sps:$4 sm:$0xff]  }
 0x137   : > { %2165 = vmatprep.subr.bf16.mxu0 %v3196_v54  ;;  %2247 = vmatprep.subr.bf16.mxu1 %v3199_v55  ;;  %v3277_v54 = vld [vmem:[#allocation8 + $0x28c] ss:$16 sps:$4 sm:$0xff]   ;;  %v3272_v55 = vld [vmem:[#allocation8 + $0x280] ss:$16 sps:$4 sm:$0xff]  }
 0x13a   : > { %2166 = vmatpush1.bf16.msra.mxu0 %v3194_v56  ;;  %2248 = vmatpush1.bf16.msra.mxu1 %v3197_v57  ;;  %v3275_v56 = vld [vmem:[#allocation8 + $0x288] ss:$16 sps:$4 sm:$0xff]   ;;  %v3280_v57 = vld [vmem:[#allocation8 + $0x2a4] ss:$16 sps:$4 sm:$0xff]  }
 0x13b   : > { %2167 = vmatprep.subr.bf16.mxu0 %v3202_v58  ;;  %2249 = vmatprep.subr.bf16.mxu1 %v3205_v59  ;;  %v3283_v58 = vld [vmem:[#allocation8 + $0x2ac] ss:$16 sps:$4 sm:$0xff]   ;;  %v3278_v59 = vld [vmem:[#allocation8 + $0x2a0] ss:$16 sps:$4 sm:$0xff]  }
 0x13e   : > { %2168 = vmatpush1.bf16.msra.mxu0 %v3200_v60  ;;  %2250 = vmatpush1.bf16.msra.mxu1 %v3203_v61  ;;  %v3281_v60 = vld [vmem:[#allocation8 + $0x2a8] ss:$16 sps:$4 sm:$0xff]   ;;  %v3286_v61 = vld [vmem:[#allocation8 + $0x2c4] ss:$16 sps:$4 sm:$0xff]  }
 0x13f   : > { %2169 = vmatprep.subr.bf16.mxu0 %v3208_v62  ;;  %2251 = vmatprep.subr.bf16.mxu1 %v3211_v63  ;;  %v3289_v62 = vld [vmem:[#allocation8 + $0x2cc] ss:$16 sps:$4 sm:$0xff]   ;;  %v3284_v63 = vld [vmem:[#allocation8 + $0x2c0] ss:$16 sps:$4 sm:$0xff]  }
 0x142   : > { %2170 = vmatpush1.bf16.msra.mxu0 %v3206_v0  ;;  %2252 = vmatpush1.bf16.msra.mxu1 %v3209_v2  ;;  %v3287_v0 = vld [vmem:[#allocation8 + $0x2c8] ss:$16 sps:$4 sm:$0xff]   ;;  %v3292_v2 = vld [vmem:[#allocation8 + $0x2e4] ss:$16 sps:$4 sm:$0xff]  }
 0x143   : > { %2171 = vmatprep.subr.bf16.mxu0 %v3214_v3  ;;  %2253 = vmatprep.subr.bf16.mxu1 %v3217_v4  ;;  %v3295_v3 = vld [vmem:[#allocation8 + $0x2ec] ss:$16 sps:$4 sm:$0xff]   ;;  %v3290_v4 = vld [vmem:[#allocation8 + $0x2e0] ss:$16 sps:$4 sm:$0xff]  }
 0x146   : > { %2172 = vmatpush1.bf16.msra.mxu0 %v3212_v6  ;;  %2254 = vmatpush1.bf16.msra.mxu1 %v3215_v7  ;;  %v3293_v6 = vld [vmem:[#allocation8 + $0x2e8] ss:$16 sps:$4 sm:$0xff]   ;;  %v3298_v7 = vld [vmem:[#allocation8 + $0x304] ss:$16 sps:$4 sm:$0xff]  }
 0x147   : > { %2173 = vmatprep.subr.bf16.mxu0 %v3220_v8  ;;  %2255 = vmatprep.subr.bf16.mxu1 %v3223_v9  ;;  %v3301_v8 = vld [vmem:[#allocation8 + $0x30c] ss:$16 sps:$4 sm:$0xff]   ;;  %v3296_v9 = vld [vmem:[#allocation8 + $0x300] ss:$16 sps:$4 sm:$0xff]  }
 0x14a   : > { %2174 = vmatpush1.bf16.msra.mxu0 %v3218_v10  ;;  %2256 = vmatpush1.bf16.msra.mxu1 %v3221_v11  ;;  %v3299_v10 = vld [vmem:[#allocation8 + $0x308] ss:$16 sps:$4 sm:$0xff]   ;;  %v3304_v11 = vld [vmem:[#allocation8 + $0x324] ss:$16 sps:$4 sm:$0xff]  }
 0x14b   : > { %2175 = vmatprep.subr.bf16.mxu0 %v3226_v12  ;;  %2257 = vmatprep.subr.bf16.mxu1 %v3229_v14  ;;  %v3307_v12 = vld [vmem:[#allocation8 + $0x32c] ss:$16 sps:$4 sm:$0xff]   ;;  %v3302_v14 = vld [vmem:[#allocation8 + $0x320] ss:$16 sps:$4 sm:$0xff]  }
 0x14e   : > { %2176 = vmatpush1.bf16.msra.mxu0 %v3224_v15  ;;  %2258 = vmatpush1.bf16.msra.mxu1 %v3227_v16  ;;  %v3305_v15 = vld [vmem:[#allocation8 + $0x328] ss:$16 sps:$4 sm:$0xff]   ;;  %v3310_v16 = vld [vmem:[#allocation8 + $0x344] ss:$16 sps:$4 sm:$0xff]  }
 0x14f   : > { %2177 = vmatprep.subr.bf16.mxu0 %v3232_v17  ;;  %2259 = vmatprep.subr.bf16.mxu1 %v3235_v18  ;;  %v3313_v17 = vld [vmem:[#allocation8 + $0x34c] ss:$16 sps:$4 sm:$0xff]   ;;  %v3308_v18 = vld [vmem:[#allocation8 + $0x340] ss:$16 sps:$4 sm:$0xff]  }
 0x152   : > { %2178 = vmatpush1.bf16.msra.mxu0 %v3230_v19  ;;  %2260 = vmatpush1.bf16.msra.mxu1 %v3233_v20  ;;  %v3311_v19 = vld [vmem:[#allocation8 + $0x348] ss:$16 sps:$4 sm:$0xff]   ;;  %v3316_v20 = vld [vmem:[#allocation8 + $0x364] ss:$16 sps:$4 sm:$0xff]  }
 0x153   : > { %2179 = vmatprep.subr.bf16.mxu0 %v3238_v21  ;;  %2261 = vmatprep.subr.bf16.mxu1 %v3241_v22  ;;  %v3319_v21 = vld [vmem:[#allocation8 + $0x36c] ss:$16 sps:$4 sm:$0xff]   ;;  %v3314_v22 = vld [vmem:[#allocation8 + $0x360] ss:$16 sps:$4 sm:$0xff]  }
 0x156   : > { %2180 = vmatpush1.bf16.msra.mxu0 %v3236_v23  ;;  %2262 = vmatpush1.bf16.msra.mxu1 %v3239_v24  ;;  %v3317_v23 = vld [vmem:[#allocation8 + $0x368] ss:$16 sps:$4 sm:$0xff]   ;;  %v3322_v24 = vld [vmem:[#allocation8 + $0x384] ss:$16 sps:$4 sm:$0xff]  }
 0x157   : > { %2181 = vmatprep.subr.bf16.mxu0 %v3244_v26  ;;  %2263 = vmatprep.subr.bf16.mxu1 %v3247_v27  ;;  %v3325_v26 = vld [vmem:[#allocation8 + $0x38c] ss:$16 sps:$4 sm:$0xff]   ;;  %v3320_v27 = vld [vmem:[#allocation8 + $0x380] ss:$16 sps:$4 sm:$0xff]  }
 0x15a   : > { %2182 = vmatpush1.bf16.msra.mxu0 %v3242_v49  ;;  %2264 = vmatpush1.bf16.msra.mxu1 %v3245_v28  ;;  %v3323_v49 = vld [vmem:[#allocation8 + $0x388] ss:$16 sps:$4 sm:$0xff]   ;;  %v3328_v28 = vld [vmem:[#allocation8 + $0x3a4] ss:$16 sps:$4 sm:$0xff]  }
 0x15b   : > { %2192 = vmatprep.subr.bf16.mxu0 %v3250_v30  ;;  %2274 = vmatprep.subr.bf16.mxu1 %v3253_v31  ;;  %v3331_v30 = vld [vmem:[#allocation8 + $0x3ac] ss:$16 sps:$4 sm:$0xff]   ;;  %v3326_v31 = vld [vmem:[#allocation8 + $0x3a0] ss:$16 sps:$4 sm:$0xff]  }
 0x15d   : > { %2184 = vmatmul.mubr.bf16.vlgmr.msra.gmra.mrb[4].mxu0 %v1357_v32  ;;  %2266 = vmatmul.mubr.bf16.vlgmr.msra.gmra.mrb[4].mxu1 %v1357_v32  ;;  %v3329_v32 = vld [vmem:[#allocation8 + $0x3a8] ss:$16 sps:$4 sm:$0xff]  }
 0x15e   : > { %2193 = vmatpush1.bf16.msra.mxu0 %v3248_v34  ;;  %2275 = vmatpush1.bf16.msra.mxu1 %v3251_v35  ;;  %v3334_v34 = vld [vmem:[#allocation8 + $0x3c4] ss:$16 sps:$4 sm:$0xff]   ;;  %v3337_v35 = vld [vmem:[#allocation8 + $0x3cc] ss:$16 sps:$4 sm:$0xff]  }
 0x15f   : > { %2194 = vmatprep.subr.bf16.mxu0 %v3256_v37  ;;  %2276 = vmatprep.subr.bf16.mxu1 %v3259_v38  ;;  %v3332_v37 = vld [vmem:[#allocation8 + $0x3c0] ss:$16 sps:$4 sm:$0xff]   ;;  %v3335_v38 = vld [vmem:[#allocation8 + $0x3c8] ss:$16 sps:$4 sm:$0xff]  }
 0x160   : > { %2224 = vmatprep.mubr.bf16.mxu0 %v1360_v39  ;;  %2306 = vmatprep.mubr.bf16.mxu1 %v1360_v39  ;;  %v3340_v39 = vld [vmem:[#allocation8 + $0x3e4] ss:$16 sps:$4 sm:$0xff]  }
 0x162   : > { %2195 = vmatpush1.bf16.msra.mxu0 %v3254_v41  ;;  %2277 = vmatpush1.bf16.msra.mxu1 %v3257_v42  ;;  %v3343_v41 = vld [vmem:[#allocation8 + $0x3ec] ss:$16 sps:$4 sm:$0xff]   ;;  %v3338_v42 = vld [vmem:[#allocation8 + $0x3e0] ss:$16 sps:$4 sm:$0xff]  }
 0x163   : > { %2196 = vmatprep.subr.bf16.mxu0 %v3262_v43  ;;  %2278 = vmatprep.subr.bf16.mxu1 %v3265_v44  ;;  %v3341_v43 = vld [vmem:[#allocation8 + $0x3e8] ss:$16 sps:$4 sm:$0xff]   ;;  %v376_v44 = vld [vmem:[%s3802_s14 + $0x10] sm:$0xff]  ;;  %s3892_s14 = scalar_lea.hbm %s3942_s7, %s2860_s20 }
 0x166   : > { %2197 = vmatpush1.bf16.msra.mxu0 %v3260_v45  ;;  %2279 = vmatpush1.bf16.msra.mxu1 %v3263_v47  ;;  %v1359_v45 = vpack.c.bf16 %v376_v44, %v376_v44  ;;  %v531_v47 = vld [vmem:[%s3938_s3] sm:$0xf] }
 0x167   : > { %2198 = vmatprep.subr.bf16.mxu0 %v3268_v48  ;;  %2280 = vmatprep.subr.bf16.mxu1 %v3271_v50  ;;  %v1176_v48 = vrot.slane %v531_v47, %v3828_v1  ;;  %v1184_v50 = vrot.slane %v531_v47, %v3838_v13 }
 0x16a   : > { %2199 = vmatpush1.bf16.msra.mxu0 %v3266_v51  ;;  %2281 = vmatpush1.bf16.msra.mxu1 %v3269_v52  ;;  %v1180_v51 = vrot.slane %v531_v47, %v3820_v46  ;;  %v1188_v52 = vrot.slane %v531_v47, %v3831_v5 }
 0x16b   : > { %2200 = vmatprep.subr.bf16.mxu0 %v3274_v53  ;;  %2282 = vmatprep.subr.bf16.mxu1 %v3277_v54 }
 0x16e   : > { %2201 = vmatpush1.bf16.msra.mxu0 %v3272_v55  ;;  %2283 = vmatpush1.bf16.msra.mxu1 %v3275_v56 }
 0x16f   : > { %2202 = vmatprep.subr.bf16.mxu0 %v3280_v57  ;;  %2284 = vmatprep.subr.bf16.mxu1 %v3283_v58 }
 0x172   : > { %2203 = vmatpush1.bf16.msra.mxu0 %v3278_v59  ;;  %2285 = vmatpush1.bf16.msra.mxu1 %v3281_v60 }
 0x173   : > { %2204 = vmatprep.subr.bf16.mxu0 %v3286_v61  ;;  %2286 = vmatprep.subr.bf16.mxu1 %v3289_v62 }
 0x176   : > { %2205 = vmatpush1.bf16.msra.mxu0 %v3284_v63  ;;  %2287 = vmatpush1.bf16.msra.mxu1 %v3287_v0 }
 0x177   : > { %2206 = vmatprep.subr.bf16.mxu0 %v3292_v2  ;;  %2288 = vmatprep.subr.bf16.mxu1 %v3295_v3 }
 0x17a   : > { %2207 = vmatpush1.bf16.msra.mxu0 %v3290_v4  ;;  %2289 = vmatpush1.bf16.msra.mxu1 %v3293_v6 }
 0x17b   : > { %2208 = vmatprep.subr.bf16.mxu0 %v3298_v7  ;;  %2290 = vmatprep.subr.bf16.mxu1 %v3301_v8 }
 0x17e   : > { %2209 = vmatpush1.bf16.msra.mxu0 %v3296_v9  ;;  %2291 = vmatpush1.bf16.msra.mxu1 %v3299_v10 }
 0x17f   : > { %2210 = vmatprep.subr.bf16.mxu0 %v3304_v11  ;;  %2292 = vmatprep.subr.bf16.mxu1 %v3307_v12 }
 0x182   : > { %2211 = vmatpush1.bf16.msra.mxu0 %v3302_v14  ;;  %2293 = vmatpush1.bf16.msra.mxu1 %v3305_v15 }
 0x183   : > { %2212 = vmatprep.subr.bf16.mxu0 %v3310_v16  ;;  %2294 = vmatprep.subr.bf16.mxu1 %v3313_v17 }
 0x186   : > { %2213 = vmatpush1.bf16.msra.mxu0 %v3308_v18  ;;  %2295 = vmatpush1.bf16.msra.mxu1 %v3311_v19 }
 0x187   : > { %2214 = vmatprep.subr.bf16.mxu0 %v3316_v20  ;;  %2296 = vmatprep.subr.bf16.mxu1 %v3319_v21 }
 0x18a   : > { %2215 = vmatpush1.bf16.msra.mxu0 %v3314_v22  ;;  %2297 = vmatpush1.bf16.msra.mxu1 %v3317_v23 }
 0x18b   : > { %2216 = vmatprep.subr.bf16.mxu0 %v3322_v24  ;;  %2298 = vmatprep.subr.bf16.mxu1 %v3325_v26 }
 0x18e   : > { %2217 = vmatpush1.bf16.msra.mxu0 %v3320_v27  ;;  %2299 = vmatpush1.bf16.msra.mxu1 %v3323_v49 }
 0x18f   : > { %2218 = vmatprep.subr.bf16.mxu0 %v3328_v28  ;;  %2300 = vmatprep.subr.bf16.mxu1 %v3331_v30 }
 0x192   : > { %2219 = vmatpush1.bf16.msra.mxu0 %v3326_v31  ;;  %2301 = vmatpush1.bf16.msra.mxu1 %v3329_v32 }
 0x193   : > { %2220 = vmatprep.subr.bf16.mxu0 %v3334_v34  ;;  %2302 = vmatprep.subr.bf16.mxu1 %v3337_v35 }
 0x196   : > { %2221 = vmatpush1.bf16.msra.mxu0 %v3332_v37  ;;  %2303 = vmatpush1.bf16.msra.mxu1 %v3335_v38 }
 0x197   : > { %2222 = vmatprep.subr.bf16.mxu0 %v3340_v39  ;;  %2304 = vmatprep.subr.bf16.mxu1 %v3343_v41  ;;  %v1489_v39 = vld [vmem:[%s3940_s5] sm:$0xf] }
 0x198   : > { %v1494_v41 = vrot.slane %v1489_v39, %v3828_v1 }
 0x19a   : > { %2223 = vmatpush1.bf16.msra.mxu0 %v3338_v42  ;;  %2305 = vmatpush1.bf16.msra.mxu1 %v3341_v43  ;;  %v1502_v42 = vrot.slane %v1489_v39, %v3838_v13  ;;  %v1498_v43 = vrot.slane %v1489_v39, %v3820_v46 }
 0x19d   : > { %2225 = vmatmul.mubr.bf16.vlgmr.msra.gmra.mrb[4].mxu0 %v1359_v45  ;;  %2307 = vmatmul.mubr.bf16.vlgmr.msra.gmra.mrb[4].mxu1 %v1359_v45 }
 0x1f0   : > { %v1268_v53 = vpop.f32.mrb[0].mxu0  ;;  %v1350_v54 = vpop.f32.mrb[0].mxu1 }
 0x1f1   : > { %v2861_v55 = vadd.f32 %v1268_v53, %v1176_v48  ;;  %v2863_v56 = vadd.f32 %v1350_v54, %v1184_v50  ;;  %v1270_v57 = vpop.f32.mrb[1].mxu0  ;;  %v1352_v58 = vpop.f32.mrb[1].mxu1 }
 0x1f2   : > { %v2862_v59 = vadd.f32 %v1270_v57, %v1180_v51  ;;  %v2864_v60 = vadd.f32 %v1352_v58, %v1188_v52  ;;  %v1272_v61 = vpop.f32.mrb[2].mxu0  ;;  %v1354_v62 = vpop.f32.mrb[2].mxu1  ;;  %v3550_v57 = vmov 1966171168  }
 0x1f3   : > { %v2318_v63 = vrot.slane %v2861_v55, %v3828_v1  ;;  %v1273_v0 = vpop.f32.mrb[3].mxu0  ;;  %v1355_v2 = vpop.f32.mrb[3].mxu1  ;;  %v2326_v3 = vrot.slane %v2863_v56, %v3828_v1  ;;  %v2392_v58 = vunpack.c.l.s4 %v3550_v57 }
 0x1f4   : > { %v2322_v4 = vrot.slane %v2862_v59, %v3828_v1  ;;  %v2330_v8 = vrot.slane %v2864_v60, %v3828_v1 }
 0x1f5   : > { %v2331_v6 = vmul.f32 %v2318_v63, %v3848_v29  ;;  %v2333_v9 = vmul.f32 %v2326_v3, %v376_v44  ;;  %v1506_v44 = vrot.slane %v1489_v39, %v3831_v5 }
 0x1f6   : > { %v2332_v7 = vmul.f32 %v2322_v4, %v3843_v25  ;;  %v2334_v11 = vmul.f32 %v2330_v8, %v3853_v33  ;;  %v2393_v4 = vunpack.c.0.s8 %v2392_v58 }
 0x1f8   : > { %v2335_v10 = vadd.f32 %v2332_v7, %v2331_v6 }
 0x1fa   : > { %v2336_v12 = vadd.f32 %v2335_v10, %v2333_v9 }
 0x1fc   : > { %v2337_v14 = vadd.f32 %v2336_v12, %v2334_v11 }
 0x1fe   : > { %2338 = vadd.xlane.f32.xlu0 %v2337_v14 }
 0x270   : > { %v2226_v15 = vpop.f32.mrb[4].mxu0  ;;  %v2308_v16 = vpop.f32.mrb[4].mxu1 }
 0x271   : > { %v2228_v17 = vpop.f32.mrb[5].mxu0  ;;  %v2310_v18 = vpop.f32.mrb[5].mxu1  ;;  %v2865_v47 = vadd.f32 %v2226_v15, %v1494_v41  ;;  %v2867_v48 = vadd.f32 %v2308_v16, %v1502_v42  ;;  %v2396_v15 = vsub.s32 %v2393_v4, %v3817_v40 }
 0x272   : > { %v2230_v19 = vpop.f32.mrb[6].mxu0  ;;  %v2312_v20 = vpop.f32.mrb[6].mxu1  ;;  %v2866_v50 = vadd.f32 %v2228_v17, %v1498_v43  ;;  %v2868_v51 = vadd.f32 %v2310_v18, %v1506_v44 }
 0x273   : > { %v2231_v21 = vpop.f32.mrb[7].mxu0  ;;  %v2313_v22 = vpop.f32.mrb[7].mxu1 }
 0x28b   : > { %v2339_v29 = vpop.xlane.xlu0 %2338 }
 0x28c   : > { %v2340_v23 = vrot.slane %v2339_v29, 4 }
 0x28e   : > { %v2341_v25 = vmax.f32 %v2339_v29, %v2340_v23 }
 0x290   : > { %v2342_v24 = vrot.slane %v2341_v25, 2 }
 0x292   : > { %v2343_v26 = vmax.f32 %v2341_v25, %v2342_v24 }
 0x294   : > { %v2344_v27 = vrot.slane %v2343_v26, 1 }
 0x296   : > { %v2345_v33 = vmax.f32 %v2343_v26, %v2344_v27 }
 0x298   : > { %v2346_v49 = vsub.f32 %v2339_v29, %v2345_v33 }
 0x29a   : > { %v2347_v28 = vmul.f32 1.442695, %v2346_v49 }
 0x29c   : > { %3344 = vpow2.f32 %v2347_v28 }
 0x2a6   : > { %v3345_v30 = vpop.eup %3344 }
 0x2a7   : > { %v2349_v31 = vrot.slane %v3345_v30, 4 }
 0x2a9   : > { %v2350_v32 = vadd.f32 %v3345_v30, %v2349_v31 }
 0x2ab   : > { %v2351_v34 = vrot.slane %v2350_v32, 2 }
 0x2ad   : > { %v2352_v35 = vadd.f32 %v2351_v34, %v2350_v32 }
 0x2af   : > { %v2353_v37 = vrot.slane %v2352_v35, 1 }
 0x2b1   : > { %v2354_v38 = vadd.f32 %v2353_v37, %v2352_v35 }
 0x2b3   : > { %3346 = vrcp.f32 %v2354_v38 }
 0x2bd   : > { %v3347_v45 = vpop.eup %3346 }
 0x2be   : > { %v2356_v52 = vmul.f32 %v3347_v45, %v3345_v30 }
 0x2c0   : > { %2420 = vst.msk [vmem:[%s372_s10] sm:$0xff] %vm2419_vm0, %v2356_v52  ;;  %v2357_v1 = vmul.f32 %v2865_v47, %v2356_v52  ;;  %v2358_v53 = vmul.f32 %v2866_v50, %v2356_v52  ;;  %v2359_v13 = vmul.f32 %v2867_v48, %v2356_v52  ;;  %v2360_v54 = vmul.f32 %v2868_v51, %v2356_v52 }
 0x2c2   : > { %v2361_v46 = vrot.slane %v2357_v1, 4  ;;  %v2367_v55 = vrot.slane %v2358_v53, 4  ;;  %v2373_v5 = vrot.slane %v2359_v13, 4  ;;  %v2379_v56 = vrot.slane %v2360_v54, 4 }
 0x2c4   : > { %v2362_v59 = vadd.f32 %v2361_v46, %v2357_v1  ;;  %v2368_v60 = vadd.f32 %v2367_v55, %v2358_v53  ;;  %v2374_v61 = vadd.f32 %v2373_v5, %v2359_v13  ;;  %v2380_v62 = vadd.f32 %v2379_v56, %v2360_v54 }
 0x2c6   : > { %v2363_v63 = vrot.slane %v2362_v59, 2  ;;  %v2369_v0 = vrot.slane %v2368_v60, 2  ;;  %v2375_v2 = vrot.slane %v2374_v61, 2  ;;  %v2381_v3 = vrot.slane %v2380_v62, 2 }
 0x2c8   : > { %v2364_v6 = vadd.f32 %v2363_v63, %v2362_v59  ;;  %v2370_v7 = vadd.f32 %v2369_v0, %v2368_v60  ;;  %v2376_v8 = vadd.f32 %v2375_v2, %v2374_v61  ;;  %v2382_v9 = vadd.f32 %v2381_v3, %v2380_v62 }
 0x2ca   : > { %v2365_v10 = vrot.slane %v2364_v6, 1  ;;  %v2371_v11 = vrot.slane %v2370_v7, 1  ;;  %v2377_v12 = vrot.slane %v2376_v8, 1  ;;  %v2383_v14 = vrot.slane %v2382_v9, 1 }
 0x2cc   : > { %v2366_v16 = vadd.f32 %v2365_v10, %v2364_v6  ;;  %v2372_v17 = vadd.f32 %v2371_v11, %v2370_v7  ;;  %v2378_v18 = vadd.f32 %v2377_v12, %v2376_v8  ;;  %v2384_v19 = vadd.f32 %v2383_v14, %v2382_v9 }
 0x2ce   : > { %v2389_v20 = vcombine.low %v2366_v16, %v2372_v17  ;;  %v2390_v21 = vcombine.low %v2378_v18, %v2384_v19 }
 0x2d0   : > { %v2397_v22 = vrot.slane %v2389_v20, %v2396_v15  ;;  %v2404_v29 = vrot.slane %v2390_v21, %v2396_v15 }
 0x2d2   : > { %v2405_v23 = vcombine.low %v2397_v22, %v2404_v29 }
 0x2d4   : > { %v2412_v25 = vrot.slane %v2405_v23, %v2396_v15 }
 0x2d6   : > { %2418 = vst.msk [vmem:[%s368_s11] sm:$0xf] %vm2416_vm1, %v2412_v25 }
 0x2d7   : > { %3477 = shalt.err (!%p3474_p1)
}
 0x2d8   : > { %s3478_s4 = scalar_lea.hbm %s3892_s14, 64  ;;  %s3482_s12 = scalar_lea.hbm %s3942_s7, 256 }
 0x2d9   : > { %p3479_p4 = scmp.ne.s32.totalorder %s3892_s14, %s3478_s4  ;;  %p3483_p8 = scmp.lt.u32.totalorder %s3892_s14, %s3942_s7 }
 0x2da   : > { %p3484_p13 = scmp.lt.u32.totalorder %s3482_s12, %s3478_s4  ;;  %p3486_p7 = scmp.lt.u32.totalorder %s3478_s4, %s3892_s14 }
 0x2db   : > { %p3480_p10 = pnand %p3479_p4, %p3967_p9 }
 0x2dc   : > { %p3485_p3 = por %p3484_p13, %p3483_p8 }
 0x2dd   : > { %p3481_p0 = pneg %p3480_p10 }
 0x2de   : > { %p3487_p12 = por %p3486_p7, %p3485_p3 }
 0x2e0   : > { %p3488_p5 = pnand %p3487_p12, %p3481_p0 }
 0x2e2   : > { %3491 = shalt.err (!%p3488_p5)
}
 0x2e3   : > { %2897 = dma.vmem_to_hbm [thread:$0]  (%p3967_p9), %s3894_s0, 64, %s3892_s14, %s2426_s30  }
 0x2e4 PF: > { %p2922_p11 = scmp.ge.s32.totalorder %s3542_s27, 2  ;;  %s2462_s10 = sand.u32 1, %s3530_s24  }
 0x2e5   : > { %p3968_p2 = scmp.ne.s32.totalorder %s3951_s8, 0  ;;  %s2463_s20 = scalar_lea.sflag [#allocation4], %s2462_s10 }
 0x2e7   : > { %p2914_p6 = pnand %p2922_p11, %p3968_p2 }
 0x2e9   : > { %3525 = dma.done.wait (!%p2914_p6), %s2463_s20, 64  }
 0x2ea   : > { %3527 = vsyncadd (!%p2914_p6), %s2463_s20, 4294967232  ;;  %p25_p1 = scmp.ge.s32.totalorder %s3694_s13, 6   ;;  %s3969_s24 = smov %s3534_s25 }
 0x2eb   : > { %s3970_s25 = smov %s3538_s26  ;;  %s3971_s26 = smov %s3710_s17 }
 0x2ec   : > { %s3972_s27 = smov %s3694_s13  ;;  %27 = sbr.rel (!%p25_p1) target bundleno = 12 (0xc), region = 122 }
 0x2f3   :  { %2468 = vsyncpa [#allocation3], 1 }
 0x2f4   :  { %2470 = vsyncpa [#allocation3 + $0x1], 1 }
 0x2f5   :  { %2471 = vsyncpa [#allocation6], 1 }
 0x2f6   :  { %2473 = vsyncpa [#allocation6 + $0x1], 1 }
 0x2f7   :  { %2474 = vsyncpa [#allocation9], 1 }
 0x2f8   :  { %2475 = vsyncpa [#allocation4], 1 }
 0x2f9   :  { %2477 = vsyncpa [#allocation4 + $0x1], 1 }

</bundles_post_ra>
